<compile_context>
chip_gen: v7x
topology: tpu7x:2x2x1
jax: 0.10.0
libtpu: 0.0.40
codegen_flags: <defaults>
</compile_context>

<pallas_src>
import jax
import jax.numpy as jnp
from jax.experimental import pallas as pl
from jax.experimental.pallas import tpu as pltpu

IN_DIM = 42
HIDDEN = 128


def mlp_kernel(x_ref,
               w1_ref, b1_ref,
               w2_ref, b2_ref,
               w3_ref, b3_ref,
               w4_ref, b4_ref,
               w5_ref, b5_ref,
               o_ref):
    # x_ref: (tb, 42) f32 straight from HBM; cast to bf16 in-register.
    # All weights are bf16; matmuls accumulate in f32 on the MXU
    # (preferred_element_type), bias-add + ReLU stay f32 on the VPU.
    x = x_ref[...].astype(jnp.bfloat16)

    h = jnp.dot(x, w1_ref[...], preferred_element_type=jnp.float32) + b1_ref[...]
    h = jnp.maximum(h, 0.0)

    h = jnp.dot(h.astype(jnp.bfloat16), w2_ref[...],
                preferred_element_type=jnp.float32) + b2_ref[...]
    h = jnp.maximum(h, 0.0)

    h = jnp.dot(h.astype(jnp.bfloat16), w3_ref[...],
                preferred_element_type=jnp.float32) + b3_ref[...]
    h = jnp.maximum(h, 0.0)

    h = jnp.dot(h.astype(jnp.bfloat16), w4_ref[...],
                preferred_element_type=jnp.float32) + b4_ref[...]
    h = jnp.maximum(h, 0.0)

    # Final layer also bf16 (f32 accumulation), output columns padded to 128.
    h = jnp.dot(h.astype(jnp.bfloat16), w5_ref[...],
                preferred_element_type=jnp.float32) + b5_ref[...]

    # bf16 output -> halved writeback bytes; lane-dense unmasked stores.
    o_ref[...] = h.astype(o_ref.dtype)


def _round_up(x, m):
    return ((x + m - 1) // m) * m


def _pick_tb(batch, tb_max):
    # Big tiles amortize the ~0.35us per-grid-step overhead, but keep at least
    # 2 grid steps when the batch allows (so v7x can shard across its 2 TCs)
    # and never use a tile much larger than the batch itself.
    return max(8, min(tb_max, _round_up(pl.cdiv(batch, 2), 8)))


def network_forward(x, params, *, tb=1024):
    """x: (B, 42) float32; params: list of (W, b) with W:(in,out), b:(1,out)."""
    B, in_dim = x.shape
    out_dim = params[-1][0].shape[1]
    pad_out = _round_up(out_dim, 128)      # lane-dense output stores

    tb = _pick_tb(B, tb)
    n_blocks = pl.cdiv(B, tb)              # partial last block is clipped by Pallas

    (w1, b1), (w2, b2), (w3, b3), (w4, b4), (w5, b5) = params

    # One-time (tiny) weight prep: bf16 weights; final layer padded to pad_out.
    w1_b = w1.astype(jnp.bfloat16)
    w2_b = w2.astype(jnp.bfloat16)
    w3_b = w3.astype(jnp.bfloat16)
    w4_b = w4.astype(jnp.bfloat16)
    w5_b = (jnp.zeros((HIDDEN, pad_out), jnp.float32)
            .at[:, :out_dim].set(w5).astype(jnp.bfloat16))
    b5_p = jnp.zeros((1, pad_out), jnp.float32).at[:, :out_dim].set(b5)

    operands = [x, w1_b, b1, w2_b, b2, w3_b, b3, w4_b, b4, w5_b, b5_p]

    def resident(shape):
        # Same block index every grid step -> stays VMEM-resident (no re-DMA).
        return pl.BlockSpec(shape, lambda i: (0, 0))

    in_specs = [pl.BlockSpec((tb, in_dim), lambda i: (i, 0))]
    in_specs += [resident(a.shape) for a in operands[1:]]

    out = pl.pallas_call(
        mlp_kernel,
        out_shape=jax.ShapeDtypeStruct((B, pad_out), jnp.bfloat16),
        grid=(n_blocks,),
        in_specs=in_specs,
        out_specs=pl.BlockSpec((tb, pad_out), lambda i: (i, 0)),
        compiler_params=pltpu.CompilerParams(
            dimension_semantics=("parallel",)),
    )(*operands)

    # Slice off the padded output columns; return f32 for API parity.
    return out[:, :out_dim].astype(jnp.float32)


def init_params(key, output_dim):
    """Deterministic init matching PyTorch Linear default (uniform +-1/sqrt(fan_in))."""
    dims = [(42, 128), (128, 128), (128, 128), (128, 128), (128, output_dim)]
    params = []
    for (fan_in, fan_out) in dims:
        key, kw, kb = jax.random.split(key, 3)
        bound = 1.0 / jnp.sqrt(fan_in)
        w = jax.random.uniform(kw, (fan_in, fan_out), jnp.float32, -bound, bound)
        b = jax.random.uniform(kb, (1, fan_out), jnp.float32, -bound, bound)
        params.append((w, b))
    return params


if __name__ == "__main__":
    key = jax.random.PRNGKey(0)
    key, kx = jax.random.split(key)

    output_dim = 7    # e.g. number of actions (Connect-4 style: 42 = 6*7 board)
    batch = 500       # non-multiple of the tile: exercises the partial last block

    x = jax.random.normal(kx, (batch, IN_DIM), jnp.float32)
    params = init_params(key, output_dim)

    out = network_forward(x, params)
    jax.block_until_ready(out)

    # Pure-JAX f32 reference (kernel runs in bf16 with f32 accumulation -> loose tol).
    ref = x
    for i, (w, b) in enumerate(params):
        ref = ref @ w + b
        if i < len(params) - 1:
            ref = jnp.maximum(ref, 0.0)

    assert out.shape == (batch, output_dim)
    max_err = float(jnp.max(jnp.abs(out - ref)))
    assert jnp.allclose(out, ref, atol=5e-2, rtol=5e-2), max_err

    # TODO(synk): RMSprop optimizer step and SmoothL1Loss are training-only and
    # intentionally not implemented (forward pass only).
    print("KERNEL_OK")
</pallas_src>

<mosaic_0001>
module attributes {stable_mosaic.version = 11 : i64} {
  func.func @mlp_kernel(%arg0: i32, %arg1: memref<256x42xf32, #tpu.memory_space<vmem>>, %arg2: memref<42x128xbf16, #tpu.memory_space<vmem>>, %arg3: memref<1x128xf32, #tpu.memory_space<vmem>>, %arg4: memref<128x128xbf16, #tpu.memory_space<vmem>>, %arg5: memref<1x128xf32, #tpu.memory_space<vmem>>, %arg6: memref<128x128xbf16, #tpu.memory_space<vmem>>, %arg7: memref<1x128xf32, #tpu.memory_space<vmem>>, %arg8: memref<128x128xbf16, #tpu.memory_space<vmem>>, %arg9: memref<1x128xf32, #tpu.memory_space<vmem>>, %arg10: memref<128x128xbf16, #tpu.memory_space<vmem>>, %arg11: memref<1x128xf32, #tpu.memory_space<vmem>>, %arg12: memref<256x128xbf16, #tpu.memory_space<vmem>>) attributes {dimension_semantics = [#tpu.dimension_semantics<parallel>], iteration_bounds = array<i64: 2>, scalar_prefetch = 0 : i64, scratch_operands = 0 : i64, tpu.core_type = #tpu.core_type<tc>, window_params = [{transform_indices = @transform_0, window_bounds = array<i64: 256, 42>}, {pipeline_mode = #tpu.pipeline_mode<synchronous>, transform_indices = @transform_1, window_bounds = array<i64: 42, 128>}, {pipeline_mode = #tpu.pipeline_mode<synchronous>, transform_indices = @transform_2, window_bounds = array<i64: 1, 128>}, {pipeline_mode = #tpu.pipeline_mode<synchronous>, transform_indices = @transform_3, window_bounds = array<i64: 128, 128>}, {pipeline_mode = #tpu.pipeline_mode<synchronous>, transform_indices = @transform_4, window_bounds = array<i64: 1, 128>}, {pipeline_mode = #tpu.pipeline_mode<synchronous>, transform_indices = @transform_5, window_bounds = array<i64: 128, 128>}, {pipeline_mode = #tpu.pipeline_mode<synchronous>, transform_indices = @transform_6, window_bounds = array<i64: 1, 128>}, {pipeline_mode = #tpu.pipeline_mode<synchronous>, transform_indices = @transform_7, window_bounds = array<i64: 128, 128>}, {pipeline_mode = #tpu.pipeline_mode<synchronous>, transform_indices = @transform_8, window_bounds = array<i64: 1, 128>}, {pipeline_mode = #tpu.pipeline_mode<synchronous>, transform_indices = @transform_9, window_bounds = array<i64: 128, 128>}, {pipeline_mode = #tpu.pipeline_mode<synchronous>, transform_indices = @transform_10, window_bounds = array<i64: 1, 128>}, {transform_indices = @transform_11, window_bounds = array<i64: 256, 128>}]} {
    %c0 = arith.constant 0 : index
    %c0_0 = arith.constant 0 : index
    %0 = vector.load %arg1[%c0, %c0_0] : memref<256x42xf32, #tpu.memory_space<vmem>>, vector<256x42xf32>
    %1 = arith.truncf %0 : vector<256x42xf32> to vector<256x42xbf16>
    %c0_1 = arith.constant 0 : index
    %c0_2 = arith.constant 0 : index
    %2 = vector.load %arg2[%c0_1, %c0_2] : memref<42x128xbf16, #tpu.memory_space<vmem>>, vector<42x128xbf16>
    %cst = arith.constant dense<0.000000e+00> : vector<256x128xf32>
    %3 = tpu.matmul %1, %2, %cst {dimension_numbers = #tpu.dot_dimension_numbers<[1], [0], [0], [1], [0, 0, 1, 1], [], []>} : vector<256x42xbf16>, vector<42x128xbf16>, vector<256x128xf32> -> vector<256x128xf32>
    %c0_3 = arith.constant 0 : index
    %c0_4 = arith.constant 0 : index
    %4 = vector.load %arg3[%c0_3, %c0_4] : memref<1x128xf32, #tpu.memory_space<vmem>>, vector<1x128xf32>
    %5 = vector.broadcast %4 : vector<1x128xf32> to vector<256x128xf32>
    %6 = arith.addf %3, %5 : vector<256x128xf32>
    %cst_5 = arith.constant 0.000000e+00 : f32
    %7 = vector.broadcast %cst_5 : f32 to vector<256x128xf32>
    %8 = arith.maximumf %6, %7 : vector<256x128xf32>
    %9 = arith.truncf %8 : vector<256x128xf32> to vector<256x128xbf16>
    %c0_6 = arith.constant 0 : index
    %c0_7 = arith.constant 0 : index
    %10 = vector.load %arg4[%c0_6, %c0_7] : memref<128x128xbf16, #tpu.memory_space<vmem>>, vector<128x128xbf16>
    %cst_8 = arith.constant dense<0.000000e+00> : vector<256x128xf32>
    %11 = tpu.matmul %9, %10, %cst_8 {dimension_numbers = #tpu.dot_dimension_numbers<[1], [0], [0], [1], [0, 0, 1, 1], [], []>} : vector<256x128xbf16>, vector<128x128xbf16>, vector<256x128xf32> -> vector<256x128xf32>
    %c0_9 = arith.constant 0 : index
    %c0_10 = arith.constant 0 : index
    %12 = vector.load %arg5[%c0_9, %c0_10] : memref<1x128xf32, #tpu.memory_space<vmem>>, vector<1x128xf32>
    %13 = vector.broadcast %12 : vector<1x128xf32> to vector<256x128xf32>
    %14 = arith.addf %11, %13 : vector<256x128xf32>
    %cst_11 = arith.constant 0.000000e+00 : f32
    %15 = vector.broadcast %cst_11 : f32 to vector<256x128xf32>
    %16 = arith.maximumf %14, %15 : vector<256x128xf32>
    %17 = arith.truncf %16 : vector<256x128xf32> to vector<256x128xbf16>
    %c0_12 = arith.constant 0 : index
    %c0_13 = arith.constant 0 : index
    %18 = vector.load %arg6[%c0_12, %c0_13] : memref<128x128xbf16, #tpu.memory_space<vmem>>, vector<128x128xbf16>
    %cst_14 = arith.constant dense<0.000000e+00> : vector<256x128xf32>
    %19 = tpu.matmul %17, %18, %cst_14 {dimension_numbers = #tpu.dot_dimension_numbers<[1], [0], [0], [1], [0, 0, 1, 1], [], []>} : vector<256x128xbf16>, vector<128x128xbf16>, vector<256x128xf32> -> vector<256x128xf32>
    %c0_15 = arith.constant 0 : index
    %c0_16 = arith.constant 0 : index
    %20 = vector.load %arg7[%c0_15, %c0_16] : memref<1x128xf32, #tpu.memory_space<vmem>>, vector<1x128xf32>
    %21 = vector.broadcast %20 : vector<1x128xf32> to vector<256x128xf32>
    %22 = arith.addf %19, %21 : vector<256x128xf32>
    %cst_17 = arith.constant 0.000000e+00 : f32
    %23 = vector.broadcast %cst_17 : f32 to vector<256x128xf32>
    %24 = arith.maximumf %22, %23 : vector<256x128xf32>
    %25 = arith.truncf %24 : vector<256x128xf32> to vector<256x128xbf16>
    %c0_18 = arith.constant 0 : index
    %c0_19 = arith.constant 0 : index
    %26 = vector.load %arg8[%c0_18, %c0_19] : memref<128x128xbf16, #tpu.memory_space<vmem>>, vector<128x128xbf16>
    %cst_20 = arith.constant dense<0.000000e+00> : vector<256x128xf32>
    %27 = tpu.matmul %25, %26, %cst_20 {dimension_numbers = #tpu.dot_dimension_numbers<[1], [0], [0], [1], [0, 0, 1, 1], [], []>} : vector<256x128xbf16>, vector<128x128xbf16>, vector<256x128xf32> -> vector<256x128xf32>
    %c0_21 = arith.constant 0 : index
    %c0_22 = arith.constant 0 : index
    %28 = vector.load %arg9[%c0_21, %c0_22] : memref<1x128xf32, #tpu.memory_space<vmem>>, vector<1x128xf32>
    %29 = vector.broadcast %28 : vector<1x128xf32> to vector<256x128xf32>
    %30 = arith.addf %27, %29 : vector<256x128xf32>
    %cst_23 = arith.constant 0.000000e+00 : f32
    %31 = vector.broadcast %cst_23 : f32 to vector<256x128xf32>
    %32 = arith.maximumf %30, %31 : vector<256x128xf32>
    %33 = arith.truncf %32 : vector<256x128xf32> to vector<256x128xbf16>
    %c0_24 = arith.constant 0 : index
    %c0_25 = arith.constant 0 : index
    %34 = vector.load %arg10[%c0_24, %c0_25] : memref<128x128xbf16, #tpu.memory_space<vmem>>, vector<128x128xbf16>
    %cst_26 = arith.constant dense<0.000000e+00> : vector<256x128xf32>
    %35 = tpu.matmul %33, %34, %cst_26 {dimension_numbers = #tpu.dot_dimension_numbers<[1], [0], [0], [1], [0, 0, 1, 1], [], []>} : vector<256x128xbf16>, vector<128x128xbf16>, vector<256x128xf32> -> vector<256x128xf32>
    %c0_27 = arith.constant 0 : index
    %c0_28 = arith.constant 0 : index
    %36 = vector.load %arg11[%c0_27, %c0_28] : memref<1x128xf32, #tpu.memory_space<vmem>>, vector<1x128xf32>
    %37 = vector.broadcast %36 : vector<1x128xf32> to vector<256x128xf32>
    %38 = arith.addf %35, %37 : vector<256x128xf32>
    %39 = arith.truncf %38 : vector<256x128xf32> to vector<256x128xbf16>
    %c0_29 = arith.constant 0 : index
    %c0_30 = arith.constant 0 : index
    %40 = vector.load %arg12[%c0_29, %c0_30] : memref<256x128xbf16, #tpu.memory_space<vmem>>, vector<256x128xbf16>
    tpu.vector_store %arg12[%c0_29, %c0_30], %39 {strides = array<i32>} : memref<256x128xbf16, #tpu.memory_space<vmem>>, vector<256x128xbf16>,
    return
  }
  func.func @transform_0(%arg0: i32) -> (i32, i32) {
    %c0_i32 = arith.constant 0 : i32
    %c0_i32_0 = arith.constant 0 : i32
    return %arg0, %c0_i32 : i32, i32
  }
  func.func @transform_1(%arg0: i32) -> (i32, i32) {
    %c0_i32 = arith.constant 0 : i32
    %c0_i32_0 = arith.constant 0 : i32
    %c0_i32_1 = arith.constant 0 : i32
    return %c0_i32, %c0_i32_0 : i32, i32
  }
  func.func @transform_2(%arg0: i32) -> (i32, i32) {
    %c0_i32 = arith.constant 0 : i32
    %c0_i32_0 = arith.constant 0 : i32
    %c0_i32_1 = arith.constant 0 : i32
    return %c0_i32, %c0_i32_0 : i32, i32
  }
  func.func @transform_3(%arg0: i32) -> (i32, i32) {
    %c0_i32 = arith.constant 0 : i32
    %c0_i32_0 = arith.constant 0 : i32
    %c0_i32_1 = arith.constant 0 : i32
    return %c0_i32, %c0_i32_0 : i32, i32
  }
  func.func @transform_4(%arg0: i32) -> (i32, i32) {
    %c0_i32 = arith.constant 0 : i32
    %c0_i32_0 = arith.constant 0 : i32
    %c0_i32_1 = arith.constant 0 : i32
    return %c0_i32, %c0_i32_0 : i32, i32
  }
  func.func @transform_5(%arg0: i32) -> (i32, i32) {
    %c0_i32 = arith.constant 0 : i32
    %c0_i32_0 = arith.constant 0 : i32
    %c0_i32_1 = arith.constant 0 : i32
    return %c0_i32, %c0_i32_0 : i32, i32
  }
  func.func @transform_6(%arg0: i32) -> (i32, i32) {
    %c0_i32 = arith.constant 0 : i32
    %c0_i32_0 = arith.constant 0 : i32
    %c0_i32_1 = arith.constant 0 : i32
    return %c0_i32, %c0_i32_0 : i32, i32
  }
  func.func @transform_7(%arg0: i32) -> (i32, i32) {
    %c0_i32 = arith.constant 0 : i32
    %c0_i32_0 = arith.constant 0 : i32
    %c0_i32_1 = arith.constant 0 : i32
    return %c0_i32, %c0_i32_0 : i32, i32
  }
  func.func @transform_8(%arg0: i32) -> (i32, i32) {
    %c0_i32 = arith.constant 0 : i32
    %c0_i32_0 = arith.constant 0 : i32
    %c0_i32_1 = arith.constant 0 : i32
    return %c0_i32, %c0_i32_0 : i32, i32
  }
  func.func @transform_9(%arg0: i32) -> (i32, i32) {
    %c0_i32 = arith.constant 0 : i32
    %c0_i32_0 = arith.constant 0 : i32
    %c0_i32_1 = arith.constant 0 : i32
    return %c0_i32, %c0_i32_0 : i32, i32
  }
  func.func @transform_10(%arg0: i32) -> (i32, i32) {
    %c0_i32 = arith.constant 0 : i32
    %c0_i32_0 = arith.constant 0 : i32
    %c0_i32_1 = arith.constant 0 : i32
    return %c0_i32, %c0_i32_0 : i32, i32
  }
  func.func @transform_11(%arg0: i32) -> (i32, i32) {
    %c0_i32 = arith.constant 0 : i32
    %c0_i32_0 = arith.constant 0 : i32
    return %arg0, %c0_i32 : i32, i32
  }
}

</mosaic_0001>

<bundles_post_ra>
// kernel: tpu_custom_call.1
= control target key start
LH: loop header
LB: loop body
LE: loop exit
PB: predicated region body
PF: predicated region fallthrough
CT: control target
= control target key end

     0   :  { %16 = vsyncpa [#allocation3], 0  ;;  %s3340_s0 = inlined_call_operand.vmem [shape: f32[500,42], index: 0, kind: input, shape index: {}]   ;;  %s3341_s1 = inlined_call_operand.vmem [shape: bf16[42,128], index: 1, kind: input, shape index: {}]   ;;  %s3342_s2 = inlined_call_operand.vmem [shape: f32[1,128], index: 2, kind: input, shape index: {}]   ;;  %s3343_s3 = inlined_call_operand.vmem [shape: bf16[128,128], index: 3, kind: input, shape index: {}]   ;;  %s3344_s4 = inlined_call_operand.vmem [shape: f32[1,128], index: 4, kind: input, shape index: {}]   ;;  %s3345_s5 = inlined_call_operand.vmem [shape: bf16[128,128], index: 5, kind: input, shape index: {}]   ;;  %s3346_s6 = inlined_call_operand.vmem [shape: f32[1,128], index: 6, kind: input, shape index: {}]   ;;  %s3347_s7 = inlined_call_operand.vmem [shape: bf16[128,128], index: 7, kind: input, shape index: {}]   ;;  %s3348_s8 = inlined_call_operand.vmem [shape: f32[1,128], index: 8, kind: input, shape index: {}]   ;;  %s3349_s9 = inlined_call_operand.vmem [shape: bf16[128,128], index: 9, kind: input, shape index: {}]   ;;  %s3350_s10 = inlined_call_operand.vmem [shape: f32[1,128], index: 10, kind: input, shape index: {}]   ;;  %s3351_s11 = inlined_call_operand.hbm [shape: bf16[500,128], index: 11, kind: output, shape index: {}]  }
   0x1   :  { %18 = vsyncpa [#allocation3 + $0x1], 0  ;;  %s2854_s17 = smov 0   ;;  %s2856_s18 = smov 0  }
   0x2   :  { %s2858_s19 = smov 0   ;;  %s2860_s20 = smov 0  }
   0x3 LB: > { %s2875_s21 = sadd.s32 4294967295, %s2789_s20   ;;  %s2067_s22 = sadd.s32 4294967294, %s2789_s20   ;;  %s2789_s20 = sphi %s2860_s20, %s3357_s20   ;;  %s2785_s19 = sphi %s2858_s19, %s3356_s19   ;;  %s2781_s18 = sphi %s2856_s18, %s3355_s18   ;;  %s2777_s17 = sphi %s2854_s17, %s3354_s17  }
   0x4   : > { %s2879_s23 = sadd.s32 1, %s2789_s20   ;;  %s267_s24 = sadd.s32 1, %s2785_s19 }
   0x5   : > { %s264_s25 = ssub.s32 %s2789_s20, %s2879_s23  ;;  %p277_p0 = scmp.ne.s32.totalorder %s2785_s19, %s2781_s18 }
   0x6   : > { %p265_p1 = scmp.eq.s32.totalorder %s264_s25, 0  ;;  %p278_p2 = scmp.eq.s32.totalorder %s2875_s21, 1 }
   0x7   : > { %p283_p3 = scmp.ne.s32.totalorder %s2781_s18, %s2777_s17  ;;  %p284_p4 = scmp.eq.s32.totalorder %s2067_s22, 1 }
   0x8   : > { %s2890_s26 = scalar_select %p265_p1, %s2785_s19, %s267_s24  }
   0x9   : > { %p2892_p5 = por %p278_p2, %p277_p0  ;;  %p2896_p6 = por %p284_p4, %p283_p3 }
   0xa   : > { %p2070_p7 = scmp.ge.s32.totalorder %s2789_s20, 1  ;;  %p349_p8 = scmp.lt.s32.totalorder %s2789_s20, 3 }
   0xc   : > { %p350_p9 = pnand %p2070_p7, %p349_p8 }
   0xd   : > { %v2692_v0 = vld [vmem:[%s3341_s1] sm:$0xff] (!%p350_p9)   ;;  %v2693_v1 = vld [vmem:[%s3341_s1 + $0x8] sm:$0xff] (!%p350_p9)   ;;  %s2909_s14 = sshll.u32 (!%p350_p9), %s2875_s21, 5  ;;  %v2694_v2 = vld [vmem:[%s3341_s1 + $0x10] sm:$0x1f] (!%p350_p9)   ;;  %vm540_vm0 = vcmask (!%p350_p9), 1044480  }
   0xe   : > { %353 = sbr.rel (%p350_p9) target bundleno = 1221 (0x4c5), region = 64  ;;  %2414 = vmatprep.subr.bf16.mxu0 (!%p350_p9), %v2692_v0  ;;  %2644 = vmatprep.subr.bf16.mxu1 (!%p350_p9), %v2692_v0  ;;  %p398_p10 = scmp.lt.s32.totalorder (!%p350_p9), %s2909_s14, 62  ;;  %v542_v3 = vsel (!%p350_p9), %vm540_vm0, %v2694_v2, 0  ;;  %v2695_v4 = vld [vmem:[%s3343_s3] sm:$0xff] (!%p350_p9)   ;;  %vm491_vm1 = vcmask (!%p350_p9), 343040   ;;  %v2696_v18 = vld [vmem:[%s3343_s3 + $0x8] sm:$0xff] (!%p350_p9)  }
   0xf   : > { %2415 = vmatpush3.bf16.msra.mxu0 (!%p350_p9), %v2692_v0  ;;  %2647 = vmatpush3.bf16.msra.mxu1 (!%p350_p9), %v2692_v0  ;;  %v2697_v30 = vld [vmem:[%s3343_s3 + $0x10] sm:$0xff] (!%p350_p9)   ;;  %v2698_v40 = vld [vmem:[%s3343_s3 + $0x18] sm:$0xff] (!%p350_p9)   ;;  %v2699_v47 = vld [vmem:[%s3343_s3 + $0x20] sm:$0xff] (!%p350_p9)   ;;  %s390_s13 = sand.u32 (!%p350_p9), 1, %s2781_s18  }
  0x10   : > { %2416 = vmatprep.subr.bf16.mxu0 (!%p350_p9), %v2693_v1  ;;  %2645 = vmatprep.subr.bf16.mxu1 (!%p350_p9), %v2693_v1  ;;  %v2700_v52 = vld [vmem:[%s3343_s3 + $0x28] sm:$0xff] (!%p350_p9)   ;;  %v2701_v58 = vld [vmem:[%s3343_s3 + $0x30] sm:$0xff] (!%p350_p9)   ;;  %v2702_v59 = vld [vmem:[%s3343_s3 + $0x38] sm:$0xff] (!%p350_p9)  }
  0x11   : > { %v2703_v60 = vld [vmem:[%s3345_s5] sm:$0xff] (!%p350_p9)   ;;  %v2704_v61 = vld [vmem:[%s3345_s5 + $0x8] sm:$0xff] (!%p350_p9)   ;;  %v2705_v62 = vld [vmem:[%s3345_s5 + $0x10] sm:$0xff] (!%p350_p9)  }
  0x12   : > { %v2706_v63 = vld [vmem:[%s3345_s5 + $0x18] sm:$0xff] (!%p350_p9)   ;;  %v2707_v0 = vld [vmem:[%s3345_s5 + $0x20] sm:$0xff] (!%p350_p9)  }
  0x13   : > { %2417 = vmatpush3.bf16.msra.mxu0 (!%p350_p9), %v2693_v1  ;;  %2648 = vmatpush3.bf16.msra.mxu1 (!%p350_p9), %v2693_v1  ;;  %v2708_v1 = vld [vmem:[%s3345_s5 + $0x28] sm:$0xff] (!%p350_p9)  }
  0x14   : > { %2650 = vmatprep.subr.msk.bf16.mxu0 (!%p350_p9), %vm540_vm0, %v2694_v2  ;;  %2651 = vmatprep.subr.msk.bf16.mxu1 (!%p350_p9), %vm540_vm0, %v2694_v2  ;;  %v3014_v2 = vld [vmem:[%s3342_s2] ss:$0 sm:$0xff] (!%p350_p9) }
  0x15   : > { %s399_s22 = scalar_select %p398_p10, %s2909_s14, 62 }
  0x16   : > { %s1994_s25 = ssub.s32 (%p2892_p5), 63, %s2909_s14 }
  0x17   : > { %s2073_s24 = sshll.u32 %s399_s22, 3  ;;  %2419 = vmatpush3.bf16.msra.mxu0 %v542_v3  ;;  %2649 = vmatpush3.bf16.msra.mxu1 %v542_v3  ;;  %s2071_s22 = sshll.u32 %s390_s13, 7 }
  0x18   : > { %s2919_s30 = scalar_lea.vmem %s3340_s0, %s2073_s24  ;;  %2452 = vmatprep.subr.bf16.mxu1 %v2695_v4  ;;  %2500 = vmatprep.subr.bf16.mxu0 %v2703_v60  ;;  %s3231_s24 = scalar_lea.vmem [#allocation2], %s2071_s22 }
  0x19   : > { %v413_v5 = vld [vmem:[%s2919_s30] sm:$0xff]  ;;  %v414_v6 = vld [vmem:[%s2919_s30 + $0x8] sm:$0xff]  ;;  %v415_v7 = vld [vmem:[%s2919_s30 + $0x10] sm:$0xff]  ;;  %p1995_p11 = scmp.lt.s32.totalorder (%p2892_p5), %s1994_s25, 32 }
  0x1a   : > { %v445_v8 = vpack.c.bf16 %v414_v6, %v413_v5  ;;  %v416_v9 = vld [vmem:[%s2919_s30 + $0x18] sm:$0xff]  ;;  %v417_v10 = vld [vmem:[%s2919_s30 + $0x20] sm:$0xff]  ;;  %v418_v11 = vld [vmem:[%s2919_s30 + $0x28] sm:$0xff] }
  0x1b   : > { %v446_v12 = vpack.c.bf16 %v416_v9, %v415_v7  ;;  %v447_v13 = vpack.c.bf16 %v418_v11, %v417_v10  ;;  %v419_v14 = vld [vmem:[%s2919_s30 + $0x30] sm:$0xff]  ;;  %v420_v15 = vld [vmem:[%s2919_s30 + $0x38] sm:$0xff]  ;;  %v429_v16 = vld [vmem:[%s2919_s30 + $0x80] sm:$0xff] }
  0x1c   : > { %2420 = vmatprep.mubr.msk.bf16.mxu0 %vm491_vm1, %v445_v8  ;;  %v430_v17 = vld [vmem:[%s2919_s30 + $0x88] sm:$0xff]  ;;  %v431_v20 = vld [vmem:[%s2919_s30 + $0x90] sm:$0xff]  ;;  %v432_v21 = vld [vmem:[%s2919_s30 + $0x98] sm:$0xff]  ;;  %v448_v28 = vpack.c.bf16 %v420_v15, %v419_v14 }
  0x1d   : > { %2421 = vmatmul.mubr.msk.bf16.vlgmr.msra.gmra.mrb[0].mxu0 %vm491_vm1, %v446_v12  ;;  %v453_v19 = vpack.c.bf16 %v430_v17, %v429_v16  ;;  %v433_v22 = vld [vmem:[%s2919_s30 + $0xa0] sm:$0xff]  ;;  %v422_v24 = vld [vmem:[%s2919_s30 + $0x48] sm:$0xff]  ;;  %v454_v25 = vpack.c.bf16 %v432_v21, %v431_v20  ;;  %v435_v29 = vld [vmem:[%s2919_s30 + $0xb0] sm:$0xff] }
  0x1e   : > { %2424 = vmatprep.mubr.msk.bf16.mxu0 %vm491_vm1, %v447_v13  ;;  %v421_v23 = vld [vmem:[%s2919_s30 + $0x40] sm:$0xff]  ;;  %v434_v26 = vld [vmem:[%s2919_s30 + $0xa8] sm:$0xff]  ;;  %v436_v32 = vld [vmem:[%s2919_s30 + $0xb8] sm:$0xff]  ;;  %2501 = vmatpush3.bf16.msra.mxu0 %v2703_v60 }
  0x1f   : > { %2436 = vmatprep.mubr.msk.bf16.mxu1 %vm491_vm1, %v453_v19  ;;  %v455_v27 = vpack.c.bf16 %v434_v26, %v433_v22  ;;  %v449_v31 = vpack.c.bf16 %v422_v24, %v421_v23  ;;  %v437_v33 = vld [vmem:[%s2919_s30 + $0xc0] sm:$0xff]  ;;  %v438_v34 = vld [vmem:[%s2919_s30 + $0xc8] sm:$0xff]  ;;  %v423_v35 = vld [vmem:[%s2919_s30 + $0x50] sm:$0xff]  ;;  %v456_v39 = vpack.c.bf16 %v436_v32, %v435_v29  ;;  %2502 = vmatprep.subr.bf16.mxu0 %v2704_v61 }
  0x20   : > { %2437 = vmatmul.mubr.msk.bf16.vlgmr.msra.gmra.mrb[0].mxu1 %vm491_vm1, %v454_v25  ;;  %v424_v36 = vld [vmem:[%s2919_s30 + $0x58] sm:$0xff]  ;;  %v425_v37 = vld [vmem:[%s2919_s30 + $0x60] sm:$0xff]  ;;  %v426_v38 = vld [vmem:[%s2919_s30 + $0x68] sm:$0xff]  ;;  %v457_v41 = vpack.c.bf16 %v438_v34, %v437_v33 }
  0x21   : > { %2440 = vmatprep.mubr.msk.bf16.mxu1 %vm491_vm1, %v455_v27  ;;  %2453 = vmatpush3.bf16.msra.mxu1 %v2695_v4  ;;  %v439_v42 = vld [vmem:[%s2919_s30 + $0xd0] sm:$0xff]  ;;  %v440_v43 = vld [vmem:[%s2919_s30 + $0xd8] sm:$0xff]  ;;  %v450_v44 = vpack.c.bf16 %v424_v36, %v423_v35  ;;  %v441_v45 = vld [vmem:[%s2919_s30 + $0xe0] sm:$0xff]  ;;  %v451_v48 = vpack.c.bf16 %v426_v38, %v425_v37 }
  0x22   : > { %2454 = vmatprep.subr.bf16.mxu1 %v2696_v18  ;;  %v442_v46 = vld [vmem:[%s2919_s30 + $0xe8] sm:$0xff]  ;;  %v427_v49 = vld [vmem:[%s2919_s30 + $0x70] sm:$0xff]  ;;  %v428_v50 = vld [vmem:[%s2919_s30 + $0x78] sm:$0xff]  ;;  %v458_v51 = vpack.c.bf16 %v440_v43, %v439_v42  ;;  %2503 = vmatpush3.bf16.msra.mxu0 %v2704_v61 }
  0x23   : > { %v459_v53 = vpack.c.bf16 %v442_v46, %v441_v45  ;;  %v443_v54 = vld [vmem:[%s2919_s30 + $0xf0] sm:$0xff]  ;;  %v444_v55 = vld [vmem:[%s2919_s30 + $0xf8] sm:$0xff]  ;;  %v452_v56 = vpack.c.bf16 %v428_v50, %v427_v49  ;;  %2504 = vmatprep.subr.bf16.mxu0 %v2705_v62  ;;  %s3279_s30 = scalar_lea.sflag [#allocation3], %s390_s13 }
  0x24   : > { %v460_v57 = vpack.c.bf16 %v444_v55, %v443_v54 }
  0x25   : > { %2425 = vmatmul.mubr.msk.bf16.gmra.mrb[4].mxu0 %vm491_vm1, %v448_v28  ;;  %2455 = vmatpush3.bf16.msra.mxu1 %v2696_v18 }
  0x26   : > { %2428 = vmatprep.mubr.msk.bf16.mxu0 %vm491_vm1, %v449_v31  ;;  %2456 = vmatprep.subr.bf16.mxu1 %v2697_v30 }
  0x27   : > { %2505 = vmatpush3.bf16.msra.mxu0 %v2705_v62 }
  0x28   : > { %2441 = vmatmul.mubr.msk.bf16.gmra.mrb[4].mxu1 %vm491_vm1, %v456_v39  ;;  %2506 = vmatprep.subr.bf16.mxu0 %v2706_v63 }
  0x29   : > { %2444 = vmatprep.mubr.msk.bf16.mxu1 %vm491_vm1, %v457_v41  ;;  %2457 = vmatpush3.bf16.msra.mxu1 %v2697_v30 }
  0x2a   : > { %2458 = vmatprep.subr.bf16.mxu1 %v2698_v40 }
  0x2b   : > { %2507 = vmatpush3.bf16.msra.mxu0 %v2706_v63 }
  0x2c   : > { %2508 = vmatprep.subr.bf16.mxu0 %v2707_v0 }
  0x2d   : > { %2429 = vmatmul.mubr.msk.bf16.gmra.mrb[8].mxu0 %vm491_vm1, %v450_v44  ;;  %2459 = vmatpush3.bf16.msra.mxu1 %v2698_v40 }
  0x2e   : > { %2432 = vmatprep.mubr.msk.bf16.mxu0 %vm491_vm1, %v451_v48  ;;  %2460 = vmatprep.subr.bf16.mxu1 %v2699_v47 }
  0x2f   : > { %2509 = vmatpush3.bf16.msra.mxu0 %v2707_v0 }
  0x30   : > { %2445 = vmatmul.mubr.msk.bf16.gmra.mrb[8].mxu1 %vm491_vm1, %v458_v51  ;;  %2510 = vmatprep.subr.bf16.mxu0 %v2708_v1 }
  0x31   : > { %2448 = vmatprep.mubr.msk.bf16.mxu1 %vm491_vm1, %v459_v53  ;;  %2461 = vmatpush3.bf16.msra.mxu1 %v2699_v47 }
  0x32   : > { %2462 = vmatprep.subr.bf16.mxu1 %v2700_v52 }
  0x33   : > { %2511 = vmatpush3.bf16.msra.mxu0 %v2708_v1 }
  0x35   : > { %2433 = vmatmul.mubr.msk.bf16.gmra.mrb[12].mxu0 %vm491_vm1, %v452_v56  ;;  %2463 = vmatpush3.bf16.msra.mxu1 %v2700_v52 }
  0x36   : > { %2464 = vmatprep.subr.bf16.mxu1 %v2701_v58 }
  0x38   : > { %2449 = vmatmul.mubr.msk.bf16.gmra.mrb[12].mxu1 %vm491_vm1, %v460_v57 }
  0x39   : > { %2465 = vmatpush3.bf16.msra.mxu1 %v2701_v58 }
  0x3a   : > { %2466 = vmatprep.subr.bf16.mxu1 %v2702_v59 }
  0x3d   : > { %2467 = vmatpush3.bf16.msra.mxu1 %v2702_v59 }
  0xf0   : > { %v2422_v3 = vpop.f32.mrb[0].mxu0 }
  0xf1   : > { %v587_v4 = vadd.f32 %v2422_v3, %v3014_v2  ;;  %v578_v5 = vpop.f32.mrb[1].mxu0 }
  0xf2   : > { %v579_v6 = vadd.f32 %v3014_v2, %v578_v5  ;;  %v2423_v7 = vpop.f32.mrb[2].mxu0 }
  0xf3   : > { %v590_v8 = vadd.f32 %v2423_v7, %v3014_v2  ;;  %v581_v9 = vpop.f32.mrb[3].mxu0  ;;  %v2438_v11 = vpop.f32.mrb[0].mxu1  ;;  %v707_v12 = vmax.f32 %v587_v4, 0.0 }
  0xf4   : > { %v582_v10 = vadd.f32 %v3014_v2, %v581_v9  ;;  %v651_v14 = vadd.f32 %v2438_v11, %v3014_v2  ;;  %v642_v15 = vpop.f32.mrb[1].mxu1  ;;  %v705_v16 = vmax.f32 %v579_v6, 0.0 }
  0xf5   : > { %v708_v13 = vmax.f32 %v590_v8, 0.0  ;;  %v643_v18 = vadd.f32 %v3014_v2, %v642_v15  ;;  %v2439_v19 = vpop.f32.mrb[2].mxu1 }
  0xf6   : > { %v706_v17 = vmax.f32 %v582_v10, 0.0  ;;  %v723_v21 = vmax.f32 %v651_v14, 0.0  ;;  %v654_v22 = vadd.f32 %v2439_v19, %v3014_v2  ;;  %v645_v23 = vpop.f32.mrb[3].mxu1 }
  0xf7   : > { %v738_v20 = vpack.c.bf16 %v708_v13, %v707_v12  ;;  %v721_v26 = vmax.f32 %v643_v18, 0.0  ;;  %v646_v27 = vadd.f32 %v3014_v2, %v645_v23 }
  0xf8   : > { %v737_v24 = vpack.c.bf16 %v706_v17, %v705_v16  ;;  %v2426_v25 = vpop.f32.mrb[4].mxu0  ;;  %v724_v30 = vmax.f32 %v654_v22, 0.0 }
  0xf9   : > { %v603_v28 = vadd.f32 %v2426_v25, %v3014_v2  ;;  %v594_v29 = vpop.f32.mrb[5].mxu0  ;;  %v722_v33 = vmax.f32 %v646_v27, 0.0 }
  0xfa   : > { %v595_v31 = vadd.f32 %v3014_v2, %v594_v29  ;;  %v2427_v32 = vpop.f32.mrb[6].mxu0  ;;  %2468 = vmatprep.mubr.bf16.mxu1 %v737_v24  ;;  %v3027_v36 = vpack.c.bf16 %v724_v30, %v723_v21 }
  0xfb   : > { %v606_v34 = vadd.f32 %v2427_v32, %v3014_v2  ;;  %v597_v35 = vpop.f32.mrb[7].mxu0  ;;  %2469 = vmatmul.mubr.bf16.vlgmr.msra.gmra.mrb[16].mxu1 %v738_v20  ;;  %v3030_v38 = vpack.c.bf16 %v722_v33, %v721_v26  ;;  %v2442_v39 = vpop.f32.mrb[4].mxu1  ;;  %v711_v40 = vmax.f32 %v603_v28, 0.0 }
  0xfc   : > { %v598_v37 = vadd.f32 %v3014_v2, %v597_v35  ;;  %v667_v42 = vadd.f32 %v2442_v39, %v3014_v2  ;;  %v658_v43 = vpop.f32.mrb[5].mxu1  ;;  %v709_v44 = vmax.f32 %v595_v31, 0.0 }
  0xfd   : > { %v712_v41 = vmax.f32 %v606_v34, 0.0  ;;  %v659_v46 = vadd.f32 %v3014_v2, %v658_v43  ;;  %v2443_v47 = vpop.f32.mrb[6].mxu1 }
  0xfe   : > { %v710_v45 = vmax.f32 %v598_v37, 0.0  ;;  %v727_v49 = vmax.f32 %v667_v42, 0.0  ;;  %v670_v50 = vadd.f32 %v2443_v47, %v3014_v2  ;;  %v661_v51 = vpop.f32.mrb[7].mxu1 }
  0xff   : > { %v740_v48 = vpack.c.bf16 %v712_v41, %v711_v40  ;;  %v725_v54 = vmax.f32 %v659_v46, 0.0  ;;  %v662_v55 = vadd.f32 %v3014_v2, %v661_v51 }
 0x100   : > { %v739_v52 = vpack.c.bf16 %v710_v45, %v709_v44  ;;  %v2430_v53 = vpop.f32.mrb[8].mxu0  ;;  %v728_v58 = vmax.f32 %v670_v50, 0.0 }
 0x101   : > { %v619_v56 = vadd.f32 %v2430_v53, %v3014_v2  ;;  %v610_v57 = vpop.f32.mrb[9].mxu0  ;;  %v726_v61 = vmax.f32 %v662_v55, 0.0  ;;  %v2713_v55 = vld [vmem:[%s3347_s7 + $0x10] sm:$0xff]  }
 0x102   : > { %v611_v59 = vadd.f32 %v3014_v2, %v610_v57  ;;  %v2431_v60 = vpop.f32.mrb[10].mxu0  ;;  %2472 = vmatprep.mubr.bf16.mxu1 %v739_v52  ;;  %v748_v0 = vpack.c.bf16 %v728_v58, %v727_v49  ;;  %v2715_v57 = vld [vmem:[%s3347_s7 + $0x20] sm:$0xff]   ;;  %v2716_v58 = vld [vmem:[%s3347_s7 + $0x28] sm:$0xff]  }
 0x103   : > { %v622_v62 = vadd.f32 %v2431_v60, %v3014_v2  ;;  %v613_v63 = vpop.f32.mrb[11].mxu0  ;;  %2473 = vmatmul.mubr.bf16.gmra.mrb[20].mxu1 %v740_v48  ;;  %v747_v3 = vpack.c.bf16 %v726_v61, %v725_v54  ;;  %v2446_v4 = vpop.f32.mrb[8].mxu1  ;;  %v715_v5 = vmax.f32 %v619_v56, 0.0  ;;  %v2710_v54 = vld [vmem:[%s3345_s5 + $0x38] sm:$0xff]   ;;  %v3084_v60 = vld [vmem:[%s3344_s4] ss:$0 sm:$0xff] }
 0x104   : > { %v614_v1 = vadd.f32 %v3014_v2, %v613_v63  ;;  %v683_v7 = vadd.f32 %v2446_v4, %v3014_v2  ;;  %v674_v8 = vpop.f32.mrb[9].mxu1  ;;  %v713_v9 = vmax.f32 %v611_v59, 0.0  ;;  %v2714_v56 = vld [vmem:[%s3347_s7 + $0x18] sm:$0xff]   ;;  %v2717_v59 = vld [vmem:[%s3347_s7 + $0x30] sm:$0xff]  }
 0x105   : > { %v716_v6 = vmax.f32 %v622_v62, 0.0  ;;  %v675_v11 = vadd.f32 %v3014_v2, %v674_v8  ;;  %v2447_v12 = vpop.f32.mrb[10].mxu1 }
 0x106   : > { %v714_v10 = vmax.f32 %v614_v1, 0.0  ;;  %v731_v14 = vmax.f32 %v683_v7, 0.0  ;;  %v686_v15 = vadd.f32 %v2447_v12, %v3014_v2  ;;  %v677_v16 = vpop.f32.mrb[11].mxu1 }
 0x107   : > { %v742_v13 = vpack.c.bf16 %v716_v6, %v715_v5  ;;  %v729_v19 = vmax.f32 %v675_v11, 0.0  ;;  %v678_v20 = vadd.f32 %v3014_v2, %v677_v16 }
 0x108   : > { %v741_v17 = vpack.c.bf16 %v714_v10, %v713_v9  ;;  %v2434_v18 = vpop.f32.mrb[12].mxu0  ;;  %v732_v23 = vmax.f32 %v686_v15, 0.0 }
 0x109   : > { %v635_v21 = vadd.f32 %v2434_v18, %v3014_v2  ;;  %v626_v22 = vpop.f32.mrb[13].mxu0  ;;  %v730_v26 = vmax.f32 %v678_v20, 0.0 }
 0x10a   : > { %v627_v24 = vadd.f32 %v3014_v2, %v626_v22  ;;  %v2435_v25 = vpop.f32.mrb[14].mxu0  ;;  %2476 = vmatprep.mubr.bf16.mxu1 %v741_v17  ;;  %v750_v29 = vpack.c.bf16 %v732_v23, %v731_v14 }
 0x10b   : > { %v638_v27 = vadd.f32 %v2435_v25, %v3014_v2  ;;  %v629_v28 = vpop.f32.mrb[15].mxu0  ;;  %2477 = vmatmul.mubr.bf16.gmra.mrb[24].mxu1 %v742_v13  ;;  %v749_v31 = vpack.c.bf16 %v730_v26, %v729_v19  ;;  %v2450_v32 = vpop.f32.mrb[12].mxu1  ;;  %v719_v33 = vmax.f32 %v635_v21, 0.0 }
 0x10c   : > { %v630_v30 = vadd.f32 %v3014_v2, %v629_v28  ;;  %v699_v35 = vadd.f32 %v2450_v32, %v3014_v2  ;;  %v690_v37 = vpop.f32.mrb[13].mxu1  ;;  %v717_v39 = vmax.f32 %v627_v24, 0.0 }
 0x10d   : > { %v720_v34 = vmax.f32 %v638_v27, 0.0  ;;  %v691_v41 = vadd.f32 %v3014_v2, %v690_v37  ;;  %v2451_v42 = vpop.f32.mrb[14].mxu1 }
 0x10e   : > { %v718_v40 = vmax.f32 %v630_v30, 0.0  ;;  %v735_v44 = vmax.f32 %v699_v35, 0.0  ;;  %v702_v45 = vadd.f32 %v2451_v42, %v3014_v2  ;;  %v693_v46 = vpop.f32.mrb[15].mxu1 }
 0x10f   : > { %v744_v43 = vpack.c.bf16 %v720_v34, %v719_v33  ;;  %v733_v48 = vmax.f32 %v691_v41, 0.0  ;;  %v694_v49 = vadd.f32 %v3014_v2, %v693_v46  ;;  %v2709_v2 = vld [vmem:[%s3345_s5 + $0x30] sm:$0xff]  }
 0x110   : > { %v743_v47 = vpack.c.bf16 %v718_v40, %v717_v39  ;;  %v736_v50 = vmax.f32 %v702_v45, 0.0  ;;  %2512 = vmatprep.subr.bf16.mxu0 %v2709_v2 }
 0x111   : > { %v734_v51 = vmax.f32 %v694_v49, 0.0  ;;  %2513 = vmatpush3.bf16.msra.mxu0 %v2709_v2 }
 0x112   : > { %2480 = vmatprep.mubr.bf16.mxu1 %v743_v47  ;;  %v752_v52 = vpack.c.bf16 %v736_v50, %v735_v44  ;;  %2514 = vmatprep.subr.bf16.mxu0 %v2710_v54 }
 0x113   : > { %2481 = vmatmul.mubr.bf16.gmra.mrb[28].mxu1 %v744_v43  ;;  %v751_v53 = vpack.c.bf16 %v734_v51, %v733_v48 }
 0x114   : > { %2484 = vmatprep.mubr.bf16.mxu1 %v3030_v38  ;;  %v2712_v38 = vld [vmem:[%s3347_s7 + $0x8] sm:$0xff]  }
 0x115   : > { %2515 = vmatpush3.bf16.msra.mxu0 %v2710_v54 }
 0x11b   : > { %2485 = vmatmul.mubr.bf16.gmra.mrb[32].mxu1 %v3027_v36  ;;  %v2711_v36 = vld [vmem:[%s3347_s7] sm:$0xff]  }
 0x11c   : > { %2488 = vmatprep.mubr.bf16.mxu1 %v747_v3  ;;  %2548 = vmatprep.subr.bf16.mxu1 %v2711_v36 }
 0x11d   : > { %2549 = vmatpush3.bf16.msra.mxu1 %v2711_v36 }
 0x11e   : > { %2550 = vmatprep.subr.bf16.mxu1 %v2712_v38 }
 0x121   : > { %2551 = vmatpush3.bf16.msra.mxu1 %v2712_v38 }
 0x122   : > { %2552 = vmatprep.subr.bf16.mxu1 %v2713_v55 }
 0x123   : > { %2489 = vmatmul.mubr.bf16.gmra.mrb[36].mxu1 %v748_v0 }
 0x124   : > { %2492 = vmatprep.mubr.bf16.mxu1 %v749_v31 }
 0x125   : > { %2553 = vmatpush3.bf16.msra.mxu1 %v2713_v55 }
 0x126   : > { %2554 = vmatprep.subr.bf16.mxu1 %v2714_v56 }
 0x129   : > { %2555 = vmatpush3.bf16.msra.mxu1 %v2714_v56 }
 0x12a   : > { %2556 = vmatprep.subr.bf16.mxu1 %v2715_v57 }
 0x12b   : > { %2493 = vmatmul.mubr.bf16.gmra.mrb[40].mxu1 %v750_v29 }
 0x12c   : > { %2496 = vmatprep.mubr.bf16.mxu1 %v751_v53 }
 0x12d   : > { %2557 = vmatpush3.bf16.msra.mxu1 %v2715_v57 }
 0x12e   : > { %2558 = vmatprep.subr.bf16.mxu1 %v2716_v58 }
 0x131   : > { %2559 = vmatpush3.bf16.msra.mxu1 %v2716_v58 }
 0x132   : > { %2560 = vmatprep.subr.bf16.mxu1 %v2717_v59 }
 0x133   : > { %2497 = vmatmul.mubr.bf16.gmra.mrb[44].mxu1 %v752_v52 }
 0x135   : > { %2561 = vmatpush3.bf16.msra.mxu1 %v2717_v59 }
 0x1ce   : > { %v2470_v61 = vpop.f32.mrb[16].mxu1 }
 0x1cf   : > { %v867_v62 = vadd.f32 %v2470_v61, %v3084_v60  ;;  %v858_v63 = vpop.f32.mrb[17].mxu1 }
 0x1d0   : > { %v859_v0 = vadd.f32 %v3084_v60, %v858_v63  ;;  %v2471_v1 = vpop.f32.mrb[18].mxu1 }
 0x1d1   : > { %v870_v3 = vadd.f32 %v2471_v1, %v3084_v60  ;;  %v861_v4 = vpop.f32.mrb[19].mxu1  ;;  %v987_v6 = vmax.f32 %v867_v62, 0.0 }
 0x1d2   : > { %v862_v5 = vadd.f32 %v3084_v60, %v861_v4  ;;  %v985_v8 = vmax.f32 %v859_v0, 0.0 }
 0x1d3   : > { %v988_v7 = vmax.f32 %v870_v3, 0.0 }
 0x1d4   : > { %v986_v9 = vmax.f32 %v862_v5, 0.0 }
 0x1d5   : > { %v1018_v10 = vpack.c.bf16 %v988_v7, %v987_v6 }
 0x1d6   : > { %v1017_v11 = vpack.c.bf16 %v986_v9, %v985_v8  ;;  %v2474_v12 = vpop.f32.mrb[20].mxu1 }
 0x1d7   : > { %v883_v13 = vadd.f32 %v2474_v12, %v3084_v60  ;;  %v874_v14 = vpop.f32.mrb[21].mxu1 }
 0x1d8   : > { %v875_v15 = vadd.f32 %v3084_v60, %v874_v14  ;;  %v2475_v16 = vpop.f32.mrb[22].mxu1  ;;  %2516 = vmatprep.mubr.bf16.mxu0 %v1017_v11 }
 0x1d9   : > { %v886_v17 = vadd.f32 %v2475_v16, %v3084_v60  ;;  %v877_v18 = vpop.f32.mrb[23].mxu1  ;;  %2517 = vmatmul.mubr.bf16.vlgmr.msra.gmra.mrb[16].mxu0 %v1018_v10  ;;  %v991_v20 = vmax.f32 %v883_v13, 0.0 }
 0x1da   : > { %v878_v19 = vadd.f32 %v3084_v60, %v877_v18  ;;  %v989_v22 = vmax.f32 %v875_v15, 0.0 }
 0x1db   : > { %v992_v21 = vmax.f32 %v886_v17, 0.0 }
 0x1dc   : > { %v990_v23 = vmax.f32 %v878_v19, 0.0 }
 0x1dd   : > { %v1020_v24 = vpack.c.bf16 %v992_v21, %v991_v20 }
 0x1de   : > { %v1019_v25 = vpack.c.bf16 %v990_v23, %v989_v22  ;;  %v2478_v26 = vpop.f32.mrb[24].mxu1 }
 0x1df   : > { %v899_v27 = vadd.f32 %v2478_v26, %v3084_v60  ;;  %v890_v28 = vpop.f32.mrb[25].mxu1 }
 0x1e0   : > { %v891_v29 = vadd.f32 %v3084_v60, %v890_v28  ;;  %v2479_v30 = vpop.f32.mrb[26].mxu1  ;;  %2520 = vmatprep.mubr.bf16.mxu0 %v1019_v25 }
 0x1e1   : > { %v902_v31 = vadd.f32 %v2479_v30, %v3084_v60  ;;  %v893_v32 = vpop.f32.mrb[27].mxu1  ;;  %2521 = vmatmul.mubr.bf16.gmra.mrb[20].mxu0 %v1020_v24  ;;  %v995_v34 = vmax.f32 %v899_v27, 0.0 }
 0x1e2   : > { %v894_v33 = vadd.f32 %v3084_v60, %v893_v32  ;;  %v993_v37 = vmax.f32 %v891_v29, 0.0 }
 0x1e3   : > { %v996_v35 = vmax.f32 %v902_v31, 0.0 }
 0x1e4   : > { %v994_v39 = vmax.f32 %v894_v33, 0.0 }
 0x1e5   : > { %v1022_v40 = vpack.c.bf16 %v996_v35, %v995_v34 }
 0x1e6   : > { %v1021_v41 = vpack.c.bf16 %v994_v39, %v993_v37  ;;  %v2482_v42 = vpop.f32.mrb[28].mxu1 }
 0x1e7   : > { %v915_v43 = vadd.f32 %v2482_v42, %v3084_v60  ;;  %v906_v44 = vpop.f32.mrb[29].mxu1 }
 0x1e8   : > { %v907_v45 = vadd.f32 %v3084_v60, %v906_v44  ;;  %v2483_v46 = vpop.f32.mrb[30].mxu1  ;;  %2524 = vmatprep.mubr.bf16.mxu0 %v1021_v41 }
 0x1e9   : > { %v918_v47 = vadd.f32 %v2483_v46, %v3084_v60  ;;  %v909_v48 = vpop.f32.mrb[31].mxu1  ;;  %2525 = vmatmul.mubr.bf16.gmra.mrb[24].mxu0 %v1022_v40  ;;  %v999_v50 = vmax.f32 %v915_v43, 0.0 }
 0x1ea   : > { %v910_v49 = vadd.f32 %v3084_v60, %v909_v48  ;;  %v997_v52 = vmax.f32 %v907_v45, 0.0 }
 0x1eb   : > { %v1000_v51 = vmax.f32 %v918_v47, 0.0 }
 0x1ec   : > { %v998_v53 = vmax.f32 %v910_v49, 0.0  ;;  %v2718_v49 = vld [vmem:[%s3347_s7 + $0x38] sm:$0xff]  }
 0x1ed   : > { %v1024_v2 = vpack.c.bf16 %v1000_v51, %v999_v50  ;;  %2562 = vmatprep.subr.bf16.mxu1 %v2718_v49  ;;  %v2719_v50 = vld [vmem:[%s3349_s9] sm:$0xff]   ;;  %v2721_v51 = vld [vmem:[%s3349_s9 + $0x10] sm:$0xff]  }
 0x1ee   : > { %v1023_v54 = vpack.c.bf16 %v998_v53, %v997_v52  ;;  %v2486_v36 = vpop.f32.mrb[32].mxu1  ;;  %2563 = vmatpush3.bf16.msra.mxu1 %v2718_v49  ;;  %2596 = vmatprep.subr.bf16.mxu0 %v2719_v50  ;;  %v2722_v52 = vld [vmem:[%s3349_s9 + $0x18] sm:$0xff]   ;;  %v2723_v53 = vld [vmem:[%s3349_s9 + $0x20] sm:$0xff]  }
 0x1ef   : > { %v931_v38 = vadd.f32 %v2486_v36, %v3084_v60  ;;  %v922_v55 = vpop.f32.mrb[33].mxu1  ;;  %2597 = vmatpush3.bf16.msra.mxu0 %v2719_v50  ;;  %v3145_v36 = vld [vmem:[%s3346_s6] ss:$0 sm:$0xff] }
 0x1f0   : > { %v923_v56 = vadd.f32 %v3084_v60, %v922_v55  ;;  %v2487_v57 = vpop.f32.mrb[34].mxu1  ;;  %2528 = vmatprep.mubr.bf16.mxu0 %v1023_v54  ;;  %v2725_v54 = vld [vmem:[%s3349_s9 + $0x30] sm:$0xff]  }
 0x1f1   : > { %v934_v58 = vadd.f32 %v2487_v57, %v3084_v60  ;;  %v925_v59 = vpop.f32.mrb[35].mxu1  ;;  %2529 = vmatmul.mubr.bf16.gmra.mrb[28].mxu0 %v1024_v2  ;;  %v1003_v62 = vmax.f32 %v931_v38, 0.0  ;;  %v2724_v2 = vld [vmem:[%s3349_s9 + $0x28] sm:$0xff]  }
 0x1f2   : > { %v926_v61 = vadd.f32 %v3084_v60, %v925_v59  ;;  %v1001_v0 = vmax.f32 %v923_v56, 0.0 }
 0x1f3   : > { %v1004_v63 = vmax.f32 %v934_v58, 0.0 }
 0x1f4   : > { %v1002_v1 = vmax.f32 %v926_v61, 0.0 }
 0x1f5   : > { %v1026_v3 = vpack.c.bf16 %v1004_v63, %v1003_v62 }
 0x1f6   : > { %v1025_v4 = vpack.c.bf16 %v1002_v1, %v1001_v0  ;;  %v2490_v5 = vpop.f32.mrb[36].mxu1 }
 0x1f7   : > { %v947_v6 = vadd.f32 %v2490_v5, %v3084_v60  ;;  %v938_v7 = vpop.f32.mrb[37].mxu1 }
 0x1f8   : > { %v939_v8 = vadd.f32 %v3084_v60, %v938_v7  ;;  %v2491_v9 = vpop.f32.mrb[38].mxu1  ;;  %2532 = vmatprep.mubr.bf16.mxu0 %v1025_v4 }
 0x1f9   : > { %v950_v10 = vadd.f32 %v2491_v9, %v3084_v60  ;;  %v941_v11 = vpop.f32.mrb[39].mxu1  ;;  %2533 = vmatmul.mubr.bf16.gmra.mrb[32].mxu0 %v1026_v3  ;;  %v1007_v13 = vmax.f32 %v947_v6, 0.0 }
 0x1fa   : > { %v942_v12 = vadd.f32 %v3084_v60, %v941_v11  ;;  %v1005_v15 = vmax.f32 %v939_v8, 0.0 }
 0x1fb   : > { %v1008_v14 = vmax.f32 %v950_v10, 0.0 }
 0x1fc   : > { %v1006_v16 = vmax.f32 %v942_v12, 0.0 }
 0x1fd   : > { %v1028_v17 = vpack.c.bf16 %v1008_v14, %v1007_v13 }
 0x1fe   : > { %v1027_v18 = vpack.c.bf16 %v1006_v16, %v1005_v15  ;;  %v2494_v19 = vpop.f32.mrb[40].mxu1 }
 0x1ff   : > { %v963_v20 = vadd.f32 %v2494_v19, %v3084_v60  ;;  %v954_v21 = vpop.f32.mrb[41].mxu1 }
 0x200   : > { %v955_v22 = vadd.f32 %v3084_v60, %v954_v21  ;;  %v2495_v23 = vpop.f32.mrb[42].mxu1  ;;  %2536 = vmatprep.mubr.bf16.mxu0 %v1027_v18 }
 0x201   : > { %v966_v24 = vadd.f32 %v2495_v23, %v3084_v60  ;;  %v957_v25 = vpop.f32.mrb[43].mxu1  ;;  %2537 = vmatmul.mubr.bf16.gmra.mrb[36].mxu0 %v1028_v17  ;;  %v1011_v27 = vmax.f32 %v963_v20, 0.0 }
 0x202   : > { %v958_v26 = vadd.f32 %v3084_v60, %v957_v25  ;;  %v1009_v29 = vmax.f32 %v955_v22, 0.0 }
 0x203   : > { %v1012_v28 = vmax.f32 %v966_v24, 0.0 }
 0x204   : > { %v1010_v30 = vmax.f32 %v958_v26, 0.0 }
 0x205   : > { %v1030_v31 = vpack.c.bf16 %v1012_v28, %v1011_v27 }
 0x206   : > { %v1029_v32 = vpack.c.bf16 %v1010_v30, %v1009_v29  ;;  %v2498_v33 = vpop.f32.mrb[44].mxu1 }
 0x207   : > { %v979_v34 = vadd.f32 %v2498_v33, %v3084_v60  ;;  %v970_v35 = vpop.f32.mrb[45].mxu1 }
 0x208   : > { %v971_v37 = vadd.f32 %v3084_v60, %v970_v35  ;;  %v2499_v39 = vpop.f32.mrb[46].mxu1  ;;  %2540 = vmatprep.mubr.bf16.mxu0 %v1029_v32 }
 0x209   : > { %v982_v40 = vadd.f32 %v2499_v39, %v3084_v60  ;;  %v973_v41 = vpop.f32.mrb[47].mxu1  ;;  %2541 = vmatmul.mubr.bf16.gmra.mrb[40].mxu0 %v1030_v31  ;;  %v1015_v43 = vmax.f32 %v979_v34, 0.0 }
 0x20a   : > { %v974_v42 = vadd.f32 %v3084_v60, %v973_v41  ;;  %v1013_v45 = vmax.f32 %v971_v37, 0.0  ;;  %v2720_v60 = vld [vmem:[%s3349_s9 + $0x8] sm:$0xff]  }
 0x20b   : > { %v1016_v44 = vmax.f32 %v982_v40, 0.0  ;;  %2598 = vmatprep.subr.bf16.mxu0 %v2720_v60 }
 0x20c   : > { %v1014_v46 = vmax.f32 %v974_v42, 0.0  ;;  %2599 = vmatpush3.bf16.msra.mxu0 %v2720_v60 }
 0x20d   : > { %v1032_v47 = vpack.c.bf16 %v1016_v44, %v1015_v43  ;;  %2600 = vmatprep.subr.bf16.mxu0 %v2721_v51 }
 0x20e   : > { %v1031_v48 = vpack.c.bf16 %v1014_v46, %v1013_v45 }
 0x210   : > { %2544 = vmatprep.mubr.bf16.mxu0 %v1031_v48  ;;  %2601 = vmatpush3.bf16.msra.mxu0 %v2721_v51 }
 0x211   : > { %2545 = vmatmul.mubr.bf16.gmra.mrb[44].mxu0 %v1032_v47  ;;  %2602 = vmatprep.subr.bf16.mxu0 %v2722_v52 }
 0x214   : > { %2603 = vmatpush3.bf16.msra.mxu0 %v2722_v52 }
 0x215   : > { %2604 = vmatprep.subr.bf16.mxu0 %v2723_v53 }
 0x218   : > { %2605 = vmatpush3.bf16.msra.mxu0 %v2723_v53 }
 0x219   : > { %2606 = vmatprep.subr.bf16.mxu0 %v2724_v2 }
 0x21c   : > { %2607 = vmatpush3.bf16.msra.mxu0 %v2724_v2 }
 0x21d   : > { %2608 = vmatprep.subr.bf16.mxu0 %v2725_v54 }
 0x220   : > { %2609 = vmatpush3.bf16.msra.mxu0 %v2725_v54 }
 0x2ac   : > { %v2518_v38 = vpop.f32.mrb[16].mxu0 }
 0x2ad   : > { %v1147_v55 = vadd.f32 %v2518_v38, %v3145_v36  ;;  %v1138_v56 = vpop.f32.mrb[17].mxu0 }
 0x2ae   : > { %v1139_v57 = vadd.f32 %v3145_v36, %v1138_v56  ;;  %v2519_v58 = vpop.f32.mrb[18].mxu0 }
 0x2af   : > { %v1150_v59 = vadd.f32 %v2519_v58, %v3145_v36  ;;  %v1141_v61 = vpop.f32.mrb[19].mxu0  ;;  %v1267_v63 = vmax.f32 %v1147_v55, 0.0 }
 0x2b0   : > { %v1142_v62 = vadd.f32 %v3145_v36, %v1141_v61  ;;  %v1265_v1 = vmax.f32 %v1139_v57, 0.0 }
 0x2b1   : > { %v1268_v0 = vmax.f32 %v1150_v59, 0.0 }
 0x2b2   : > { %v1266_v3 = vmax.f32 %v1142_v62, 0.0 }
 0x2b3   : > { %v1298_v4 = vpack.c.bf16 %v1268_v0, %v1267_v63 }
 0x2b4   : > { %v1297_v5 = vpack.c.bf16 %v1266_v3, %v1265_v1  ;;  %v2522_v6 = vpop.f32.mrb[20].mxu0 }
 0x2b5   : > { %v1163_v7 = vadd.f32 %v2522_v6, %v3145_v36  ;;  %v1154_v8 = vpop.f32.mrb[21].mxu0 }
 0x2b6   : > { %v1155_v9 = vadd.f32 %v3145_v36, %v1154_v8  ;;  %v2523_v10 = vpop.f32.mrb[22].mxu0  ;;  %2564 = vmatprep.mubr.bf16.mxu1 %v1297_v5 }
 0x2b7   : > { %v1166_v11 = vadd.f32 %v2523_v10, %v3145_v36  ;;  %v1157_v12 = vpop.f32.mrb[23].mxu0  ;;  %2565 = vmatmul.mubr.bf16.vlgmr.msra.gmra.mrb[48].mxu1 %v1298_v4  ;;  %v1271_v14 = vmax.f32 %v1163_v7, 0.0 }
 0x2b8   : > { %v1158_v13 = vadd.f32 %v3145_v36, %v1157_v12  ;;  %v1269_v16 = vmax.f32 %v1155_v9, 0.0 }
 0x2b9   : > { %v1272_v15 = vmax.f32 %v1166_v11, 0.0 }
 0x2ba   : > { %v1270_v17 = vmax.f32 %v1158_v13, 0.0 }
 0x2bb   : > { %v1300_v18 = vpack.c.bf16 %v1272_v15, %v1271_v14 }
 0x2bc   : > { %v1299_v19 = vpack.c.bf16 %v1270_v17, %v1269_v16  ;;  %v2526_v20 = vpop.f32.mrb[24].mxu0 }
 0x2bd   : > { %v1179_v21 = vadd.f32 %v2526_v20, %v3145_v36  ;;  %v1170_v22 = vpop.f32.mrb[25].mxu0 }
 0x2be   : > { %v1171_v23 = vadd.f32 %v3145_v36, %v1170_v22  ;;  %v2527_v24 = vpop.f32.mrb[26].mxu0  ;;  %2568 = vmatprep.mubr.bf16.mxu1 %v1299_v19 }
 0x2bf   : > { %v1182_v25 = vadd.f32 %v2527_v24, %v3145_v36  ;;  %v1173_v26 = vpop.f32.mrb[27].mxu0  ;;  %2569 = vmatmul.mubr.bf16.gmra.mrb[52].mxu1 %v1300_v18  ;;  %v1275_v28 = vmax.f32 %v1179_v21, 0.0 }
 0x2c0   : > { %v1174_v27 = vadd.f32 %v3145_v36, %v1173_v26  ;;  %v1273_v30 = vmax.f32 %v1171_v23, 0.0 }
 0x2c1   : > { %v1276_v29 = vmax.f32 %v1182_v25, 0.0 }
 0x2c2   : > { %v1274_v31 = vmax.f32 %v1174_v27, 0.0 }
 0x2c3   : > { %v1302_v32 = vpack.c.bf16 %v1276_v29, %v1275_v28 }
 0x2c4   : > { %v1301_v33 = vpack.c.bf16 %v1274_v31, %v1273_v30  ;;  %v2530_v34 = vpop.f32.mrb[28].mxu0 }
 0x2c5   : > { %v1195_v35 = vadd.f32 %v2530_v34, %v3145_v36  ;;  %v1186_v37 = vpop.f32.mrb[29].mxu0 }
 0x2c6   : > { %v1187_v39 = vadd.f32 %v3145_v36, %v1186_v37  ;;  %v2531_v40 = vpop.f32.mrb[30].mxu0  ;;  %2572 = vmatprep.mubr.bf16.mxu1 %v1301_v33 }
 0x2c7   : > { %v1198_v41 = vadd.f32 %v2531_v40, %v3145_v36  ;;  %v1189_v42 = vpop.f32.mrb[31].mxu0  ;;  %2573 = vmatmul.mubr.bf16.gmra.mrb[56].mxu1 %v1302_v32  ;;  %v1279_v44 = vmax.f32 %v1195_v35, 0.0 }
 0x2c8   : > { %v1190_v43 = vadd.f32 %v3145_v36, %v1189_v42  ;;  %v1277_v46 = vmax.f32 %v1187_v39, 0.0 }
 0x2c9   : > { %v1280_v45 = vmax.f32 %v1198_v41, 0.0 }
 0x2ca   : > { %v1278_v47 = vmax.f32 %v1190_v43, 0.0  ;;  %v2726_v43 = vld [vmem:[%s3349_s9 + $0x38] sm:$0xff]  }
 0x2cb   : > { %v1304_v48 = vpack.c.bf16 %v1280_v45, %v1279_v44  ;;  %2610 = vmatprep.subr.bf16.mxu0 %v2726_v43  ;;  %v3185_v44 = vld [vmem:[%s3348_s8] ss:$0 sm:$0xff] }
 0x2cc   : > { %v1303_v49 = vpack.c.bf16 %v1278_v47, %v1277_v46  ;;  %v2534_v50 = vpop.f32.mrb[32].mxu0  ;;  %2611 = vmatpush3.bf16.msra.mxu0 %v2726_v43 }
 0x2cd   : > { %v1211_v60 = vadd.f32 %v2534_v50, %v3145_v36  ;;  %v1202_v51 = vpop.f32.mrb[33].mxu0 }
 0x2ce   : > { %v1203_v52 = vadd.f32 %v3145_v36, %v1202_v51  ;;  %v2535_v53 = vpop.f32.mrb[34].mxu0  ;;  %2576 = vmatprep.mubr.bf16.mxu1 %v1303_v49 }
 0x2cf   : > { %v1214_v2 = vadd.f32 %v2535_v53, %v3145_v36  ;;  %v1205_v54 = vpop.f32.mrb[35].mxu0  ;;  %2577 = vmatmul.mubr.bf16.gmra.mrb[60].mxu1 %v1304_v48  ;;  %v1283_v55 = vmax.f32 %v1211_v60, 0.0 }
 0x2d0   : > { %v1206_v38 = vadd.f32 %v3145_v36, %v1205_v54  ;;  %v1281_v57 = vmax.f32 %v1203_v52, 0.0 }
 0x2d1   : > { %v1284_v56 = vmax.f32 %v1214_v2, 0.0 }
 0x2d2   : > { %v1282_v58 = vmax.f32 %v1206_v38, 0.0 }
 0x2d3   : > { %v1306_v59 = vpack.c.bf16 %v1284_v56, %v1283_v55 }
 0x2d4   : > { %v1305_v61 = vpack.c.bf16 %v1282_v58, %v1281_v57  ;;  %v2538_v62 = vpop.f32.mrb[36].mxu0 }
 0x2d5   : > { %v1227_v63 = vadd.f32 %v2538_v62, %v3145_v36  ;;  %v1218_v0 = vpop.f32.mrb[37].mxu0 }
 0x2d6   : > { %v1219_v1 = vadd.f32 %v3145_v36, %v1218_v0  ;;  %v2539_v3 = vpop.f32.mrb[38].mxu0  ;;  %2580 = vmatprep.mubr.bf16.mxu1 %v1305_v61 }
 0x2d7   : > { %v1230_v4 = vadd.f32 %v2539_v3, %v3145_v36  ;;  %v1221_v5 = vpop.f32.mrb[39].mxu0  ;;  %2581 = vmatmul.mubr.bf16.gmra.mrb[64].mxu1 %v1306_v59  ;;  %v1287_v7 = vmax.f32 %v1227_v63, 0.0 }
 0x2d8   : > { %v1222_v6 = vadd.f32 %v3145_v36, %v1221_v5  ;;  %v1285_v9 = vmax.f32 %v1219_v1, 0.0 }
 0x2d9   : > { %v1288_v8 = vmax.f32 %v1230_v4, 0.0 }
 0x2da   : > { %v1286_v10 = vmax.f32 %v1222_v6, 0.0 }
 0x2db   : > { %v1308_v11 = vpack.c.bf16 %v1288_v8, %v1287_v7 }
 0x2dc   : > { %v1307_v12 = vpack.c.bf16 %v1286_v10, %v1285_v9  ;;  %v2542_v13 = vpop.f32.mrb[40].mxu0 }
 0x2dd   : > { %v1243_v14 = vadd.f32 %v2542_v13, %v3145_v36  ;;  %v1234_v15 = vpop.f32.mrb[41].mxu0 }
 0x2de   : > { %v1235_v16 = vadd.f32 %v3145_v36, %v1234_v15  ;;  %v2543_v17 = vpop.f32.mrb[42].mxu0  ;;  %2584 = vmatprep.mubr.bf16.mxu1 %v1307_v12 }
 0x2df   : > { %v1246_v18 = vadd.f32 %v2543_v17, %v3145_v36  ;;  %v1237_v19 = vpop.f32.mrb[43].mxu0  ;;  %2585 = vmatmul.mubr.bf16.gmra.mrb[68].mxu1 %v1308_v11  ;;  %v1291_v21 = vmax.f32 %v1243_v14, 0.0 }
 0x2e0   : > { %v1238_v20 = vadd.f32 %v3145_v36, %v1237_v19  ;;  %v1289_v23 = vmax.f32 %v1235_v16, 0.0 }
 0x2e1   : > { %v1292_v22 = vmax.f32 %v1246_v18, 0.0 }
 0x2e2   : > { %v1290_v24 = vmax.f32 %v1238_v20, 0.0 }
 0x2e3   : > { %v1310_v25 = vpack.c.bf16 %v1292_v22, %v1291_v21 }
 0x2e4   : > { %v1309_v26 = vpack.c.bf16 %v1290_v24, %v1289_v23  ;;  %v2546_v27 = vpop.f32.mrb[44].mxu0 }
 0x2e5   : > { %v1259_v28 = vadd.f32 %v2546_v27, %v3145_v36  ;;  %v1250_v29 = vpop.f32.mrb[45].mxu0 }
 0x2e6   : > { %v1251_v30 = vadd.f32 %v3145_v36, %v1250_v29  ;;  %v2547_v31 = vpop.f32.mrb[46].mxu0  ;;  %2588 = vmatprep.mubr.bf16.mxu1 %v1309_v26 }
 0x2e7   : > { %v1262_v32 = vadd.f32 %v2547_v31, %v3145_v36  ;;  %v1253_v33 = vpop.f32.mrb[47].mxu0  ;;  %2589 = vmatmul.mubr.bf16.gmra.mrb[72].mxu1 %v1310_v25  ;;  %v1295_v35 = vmax.f32 %v1259_v28, 0.0 }
 0x2e8   : > { %v1254_v34 = vadd.f32 %v3145_v36, %v1253_v33  ;;  %v1293_v39 = vmax.f32 %v1251_v30, 0.0 }
 0x2e9   : > { %v1296_v37 = vmax.f32 %v1262_v32, 0.0 }
 0x2ea   : > { %v1294_v40 = vmax.f32 %v1254_v34, 0.0 }
 0x2eb   : > { %v1312_v41 = vpack.c.bf16 %v1296_v37, %v1295_v35 }
 0x2ec   : > { %v1311_v42 = vpack.c.bf16 %v1294_v40, %v1293_v39 }
 0x2ee   : > { %2592 = vmatprep.mubr.bf16.mxu1 %v1311_v42 }
 0x2ef   : > { %2593 = vmatmul.mubr.bf16.gmra.mrb[76].mxu1 %v1312_v41 }
 0x38a   : > { %v2566_v36 = vpop.f32.mrb[48].mxu1 }
 0x38b   : > { %v1427_v45 = vadd.f32 %v2566_v36, %v3185_v44  ;;  %v1418_v46 = vpop.f32.mrb[49].mxu1 }
 0x38c   : > { %v1419_v47 = vadd.f32 %v3185_v44, %v1418_v46  ;;  %v2567_v48 = vpop.f32.mrb[50].mxu1 }
 0x38d   : > { %v1430_v49 = vadd.f32 %v2567_v48, %v3185_v44  ;;  %v1421_v50 = vpop.f32.mrb[51].mxu1  ;;  %v1547_v51 = vmax.f32 %v1427_v45, 0.0 }
 0x38e   : > { %v1422_v60 = vadd.f32 %v3185_v44, %v1421_v50  ;;  %v1545_v53 = vmax.f32 %v1419_v47, 0.0 }
 0x38f   : > { %v1548_v52 = vmax.f32 %v1430_v49, 0.0 }
 0x390   : > { %v1546_v2 = vmax.f32 %v1422_v60, 0.0 }
 0x391   : > { %v1578_v54 = vpack.c.bf16 %v1548_v52, %v1547_v51 }
 0x392   : > { %v1577_v38 = vpack.c.bf16 %v1546_v2, %v1545_v53  ;;  %v2570_v55 = vpop.f32.mrb[52].mxu1 }
 0x393   : > { %v1443_v56 = vadd.f32 %v2570_v55, %v3185_v44  ;;  %v1434_v57 = vpop.f32.mrb[53].mxu1 }
 0x394   : > { %v1435_v58 = vadd.f32 %v3185_v44, %v1434_v57  ;;  %v2571_v59 = vpop.f32.mrb[54].mxu1  ;;  %2612 = vmatprep.mubr.bf16.mxu0 %v1577_v38 }
 0x395   : > { %v1446_v61 = vadd.f32 %v2571_v59, %v3185_v44  ;;  %v1437_v62 = vpop.f32.mrb[55].mxu1  ;;  %2613 = vmatmul.mubr.bf16.vlgmr.msra.gmra.mrb[48].mxu0 %v1578_v54  ;;  %v1551_v0 = vmax.f32 %v1443_v56, 0.0 }
 0x396   : > { %v1438_v63 = vadd.f32 %v3185_v44, %v1437_v62  ;;  %v1549_v3 = vmax.f32 %v1435_v58, 0.0 }
 0x397   : > { %v1552_v1 = vmax.f32 %v1446_v61, 0.0 }
 0x398   : > { %v1550_v4 = vmax.f32 %v1438_v63, 0.0 }
 0x399   : > { %v1580_v5 = vpack.c.bf16 %v1552_v1, %v1551_v0 }
 0x39a   : > { %v1579_v6 = vpack.c.bf16 %v1550_v4, %v1549_v3  ;;  %v2574_v7 = vpop.f32.mrb[56].mxu1 }
 0x39b   : > { %v1459_v8 = vadd.f32 %v2574_v7, %v3185_v44  ;;  %v1450_v9 = vpop.f32.mrb[57].mxu1 }
 0x39c   : > { %v1451_v10 = vadd.f32 %v3185_v44, %v1450_v9  ;;  %v2575_v11 = vpop.f32.mrb[58].mxu1  ;;  %2616 = vmatprep.mubr.bf16.mxu0 %v1579_v6 }
 0x39d   : > { %v1462_v12 = vadd.f32 %v2575_v11, %v3185_v44  ;;  %v1453_v13 = vpop.f32.mrb[59].mxu1  ;;  %2617 = vmatmul.mubr.bf16.gmra.mrb[52].mxu0 %v1580_v5  ;;  %v1555_v15 = vmax.f32 %v1459_v8, 0.0 }
 0x39e   : > { %v1454_v14 = vadd.f32 %v3185_v44, %v1453_v13  ;;  %v1553_v17 = vmax.f32 %v1451_v10, 0.0 }
 0x39f   : > { %v1556_v16 = vmax.f32 %v1462_v12, 0.0 }
 0x3a0   : > { %v1554_v18 = vmax.f32 %v1454_v14, 0.0 }
 0x3a1   : > { %v1582_v19 = vpack.c.bf16 %v1556_v16, %v1555_v15 }
 0x3a2   : > { %v1581_v20 = vpack.c.bf16 %v1554_v18, %v1553_v17  ;;  %v2578_v21 = vpop.f32.mrb[60].mxu1 }
 0x3a3   : > { %v1475_v22 = vadd.f32 %v2578_v21, %v3185_v44  ;;  %v1466_v23 = vpop.f32.mrb[61].mxu1 }
 0x3a4   : > { %v1467_v24 = vadd.f32 %v3185_v44, %v1466_v23  ;;  %v2579_v25 = vpop.f32.mrb[62].mxu1  ;;  %2620 = vmatprep.mubr.bf16.mxu0 %v1581_v20 }
 0x3a5   : > { %v1478_v26 = vadd.f32 %v2579_v25, %v3185_v44  ;;  %v1469_v27 = vpop.f32.mrb[63].mxu1  ;;  %2621 = vmatmul.mubr.bf16.gmra.mrb[56].mxu0 %v1582_v19  ;;  %v1559_v29 = vmax.f32 %v1475_v22, 0.0 }
 0x3a6   : > { %v1470_v28 = vadd.f32 %v3185_v44, %v1469_v27  ;;  %v1557_v31 = vmax.f32 %v1467_v24, 0.0 }
 0x3a7   : > { %v1560_v30 = vmax.f32 %v1478_v26, 0.0 }
 0x3a8   : > { %v1558_v32 = vmax.f32 %v1470_v28, 0.0 }
 0x3a9   : > { %v1584_v33 = vpack.c.bf16 %v1560_v30, %v1559_v29  ;;  %v3223_v29 = vld [vmem:[%s3350_s10] ss:$0 sm:$0xff] }
 0x3aa   : > { %v1583_v34 = vpack.c.bf16 %v1558_v32, %v1557_v31  ;;  %v2582_v35 = vpop.f32.mrb[64].mxu1 }
 0x3ab   : > { %v1491_v37 = vadd.f32 %v2582_v35, %v3185_v44  ;;  %v1482_v39 = vpop.f32.mrb[65].mxu1 }
 0x3ac   : > { %v1483_v40 = vadd.f32 %v3185_v44, %v1482_v39  ;;  %v2583_v41 = vpop.f32.mrb[66].mxu1  ;;  %2624 = vmatprep.mubr.bf16.mxu0 %v1583_v34 }
 0x3ad   : > { %v1494_v42 = vadd.f32 %v2583_v41, %v3185_v44  ;;  %v1485_v43 = vpop.f32.mrb[67].mxu1  ;;  %2625 = vmatmul.mubr.bf16.gmra.mrb[60].mxu0 %v1584_v33  ;;  %v1563_v45 = vmax.f32 %v1491_v37, 0.0 }
 0x3ae   : > { %v1486_v36 = vadd.f32 %v3185_v44, %v1485_v43  ;;  %v1561_v47 = vmax.f32 %v1483_v40, 0.0 }
 0x3af   : > { %v1564_v46 = vmax.f32 %v1494_v42, 0.0 }
 0x3b0   : > { %v1562_v48 = vmax.f32 %v1486_v36, 0.0 }
 0x3b1   : > { %v1586_v49 = vpack.c.bf16 %v1564_v46, %v1563_v45 }
 0x3b2   : > { %v1585_v50 = vpack.c.bf16 %v1562_v48, %v1561_v47  ;;  %v2586_v60 = vpop.f32.mrb[68].mxu1 }
 0x3b3   : > { %v1507_v51 = vadd.f32 %v2586_v60, %v3185_v44  ;;  %v1498_v52 = vpop.f32.mrb[69].mxu1 }
 0x3b4   : > { %v1499_v53 = vadd.f32 %v3185_v44, %v1498_v52  ;;  %v2587_v2 = vpop.f32.mrb[70].mxu1  ;;  %2628 = vmatprep.mubr.bf16.mxu0 %v1585_v50 }
 0x3b5   : > { %v1510_v54 = vadd.f32 %v2587_v2, %v3185_v44  ;;  %v1501_v38 = vpop.f32.mrb[71].mxu1  ;;  %2629 = vmatmul.mubr.bf16.gmra.mrb[64].mxu0 %v1586_v49  ;;  %v1567_v56 = vmax.f32 %v1507_v51, 0.0 }
 0x3b6   : > { %v1502_v55 = vadd.f32 %v3185_v44, %v1501_v38  ;;  %v1565_v58 = vmax.f32 %v1499_v53, 0.0 }
 0x3b7   : > { %v1568_v57 = vmax.f32 %v1510_v54, 0.0 }
 0x3b8   : > { %v1566_v59 = vmax.f32 %v1502_v55, 0.0 }
 0x3b9   : > { %v1588_v61 = vpack.c.bf16 %v1568_v57, %v1567_v56 }
 0x3ba   : > { %v1587_v62 = vpack.c.bf16 %v1566_v59, %v1565_v58  ;;  %v2590_v63 = vpop.f32.mrb[72].mxu1 }
 0x3bb   : > { %v1523_v0 = vadd.f32 %v2590_v63, %v3185_v44  ;;  %v1514_v1 = vpop.f32.mrb[73].mxu1 }
 0x3bc   : > { %v1515_v3 = vadd.f32 %v3185_v44, %v1514_v1  ;;  %v2591_v4 = vpop.f32.mrb[74].mxu1  ;;  %2632 = vmatprep.mubr.bf16.mxu0 %v1587_v62 }
 0x3bd   : > { %v1526_v5 = vadd.f32 %v2591_v4, %v3185_v44  ;;  %v1517_v6 = vpop.f32.mrb[75].mxu1  ;;  %2633 = vmatmul.mubr.bf16.gmra.mrb[68].mxu0 %v1588_v61  ;;  %v1571_v8 = vmax.f32 %v1523_v0, 0.0 }
 0x3be   : > { %v1518_v7 = vadd.f32 %v3185_v44, %v1517_v6  ;;  %v1569_v10 = vmax.f32 %v1515_v3, 0.0 }
 0x3bf   : > { %v1572_v9 = vmax.f32 %v1526_v5, 0.0 }
 0x3c0   : > { %v1570_v11 = vmax.f32 %v1518_v7, 0.0 }
 0x3c1   : > { %v1590_v12 = vpack.c.bf16 %v1572_v9, %v1571_v8 }
 0x3c2   : > { %v1589_v13 = vpack.c.bf16 %v1570_v11, %v1569_v10  ;;  %v2594_v14 = vpop.f32.mrb[76].mxu1 }
 0x3c3   : > { %v1539_v15 = vadd.f32 %v2594_v14, %v3185_v44  ;;  %v1530_v16 = vpop.f32.mrb[77].mxu1 }
 0x3c4   : > { %v1531_v17 = vadd.f32 %v3185_v44, %v1530_v16  ;;  %v2595_v18 = vpop.f32.mrb[78].mxu1  ;;  %2636 = vmatprep.mubr.bf16.mxu0 %v1589_v13 }
 0x3c5   : > { %v1542_v19 = vadd.f32 %v2595_v18, %v3185_v44  ;;  %v1533_v20 = vpop.f32.mrb[79].mxu1  ;;  %2637 = vmatmul.mubr.bf16.gmra.mrb[72].mxu0 %v1590_v12  ;;  %v1575_v22 = vmax.f32 %v1539_v15, 0.0 }
 0x3c6   : > { %v1534_v21 = vadd.f32 %v3185_v44, %v1533_v20  ;;  %v1573_v24 = vmax.f32 %v1531_v17, 0.0 }
 0x3c7   : > { %v1576_v23 = vmax.f32 %v1542_v19, 0.0 }
 0x3c8   : > { %v1574_v25 = vmax.f32 %v1534_v21, 0.0 }
 0x3c9   : > { %v1592_v26 = vpack.c.bf16 %v1576_v23, %v1575_v22 }
 0x3ca   : > { %v1591_v27 = vpack.c.bf16 %v1574_v25, %v1573_v24 }
 0x3cc   : > { %2640 = vmatprep.mubr.bf16.mxu0 %v1591_v27 }
 0x3cd   : > { %2641 = vmatmul.mubr.bf16.gmra.mrb[76].mxu0 %v1592_v26 }
 0x468   : > { %v2614_v28 = vpop.f32.mrb[48].mxu0 }
 0x469   : > { %v1698_v30 = vpop.f32.mrb[49].mxu0  ;;  %v1707_v44 = vadd.f32 %v2614_v28, %v3223_v29 }
 0x46a   : > { %v2615_v31 = vpop.f32.mrb[50].mxu0  ;;  %v1699_v34 = vadd.f32 %v3223_v29, %v1698_v30 }
 0x46b   : > { %v1710_v32 = vadd.f32 %v2615_v31, %v3223_v29  ;;  %v1701_v33 = vpop.f32.mrb[51].mxu0 }
 0x46c   : > { %v1702_v35 = vadd.f32 %v3223_v29, %v1701_v33 }
 0x46d   : > { %v2212_v37 = vpack.c.bf16 %v1710_v32, %v1707_v44 }
 0x46e   : > { %v2207_v39 = vpack.c.bf16 %v1702_v35, %v1699_v34 }
 0x46f   : > { %2284 = vst [vmem:[%s3231_s24 + $0x8] sm:$0xff] %v2212_v37  }
 0x470   : > { %2208 = vst [vmem:[%s3231_s24] sm:$0xff] %v2207_v39   ;;  %v2618_v40 = vpop.f32.mrb[52].mxu0 }
 0x471   : > { %v1714_v41 = vpop.f32.mrb[53].mxu0  ;;  %v1723_v43 = vadd.f32 %v2618_v40, %v3223_v29 }
 0x472   : > { %v2619_v42 = vpop.f32.mrb[54].mxu0  ;;  %v1715_v46 = vadd.f32 %v3223_v29, %v1714_v41 }
 0x473   : > { %v1726_v36 = vadd.f32 %v2619_v42, %v3223_v29  ;;  %v1717_v45 = vpop.f32.mrb[55].mxu0 }
 0x474   : > { %v1718_v47 = vadd.f32 %v3223_v29, %v1717_v45 }
 0x475   : > { %v2222_v48 = vpack.c.bf16 %v1726_v36, %v1723_v43 }
 0x476   : > { %v2217_v49 = vpack.c.bf16 %v1718_v47, %v1715_v46 }
 0x477   : > { %2286 = vst [vmem:[%s3231_s24 + $0x18] sm:$0xff] %v2222_v48  }
 0x478   : > { %2285 = vst [vmem:[%s3231_s24 + $0x10] sm:$0xff] %v2217_v49   ;;  %v2622_v50 = vpop.f32.mrb[56].mxu0 }
 0x479   : > { %v1730_v60 = vpop.f32.mrb[57].mxu0  ;;  %v1739_v52 = vadd.f32 %v2622_v50, %v3223_v29 }
 0x47a   : > { %v2623_v51 = vpop.f32.mrb[58].mxu0  ;;  %v1731_v54 = vadd.f32 %v3223_v29, %v1730_v60 }
 0x47b   : > { %v1742_v53 = vadd.f32 %v2623_v51, %v3223_v29  ;;  %v1733_v2 = vpop.f32.mrb[59].mxu0 }
 0x47c   : > { %v1734_v38 = vadd.f32 %v3223_v29, %v1733_v2 }
 0x47d   : > { %v2232_v55 = vpack.c.bf16 %v1742_v53, %v1739_v52 }
 0x47e   : > { %v2227_v56 = vpack.c.bf16 %v1734_v38, %v1731_v54 }
 0x47f   : > { %2288 = vst [vmem:[%s3231_s24 + $0x28] sm:$0xff] %v2232_v55  }
 0x480   : > { %2287 = vst [vmem:[%s3231_s24 + $0x20] sm:$0xff] %v2227_v56   ;;  %v2626_v57 = vpop.f32.mrb[60].mxu0 }
 0x481   : > { %v1746_v58 = vpop.f32.mrb[61].mxu0  ;;  %v1755_v61 = vadd.f32 %v2626_v57, %v3223_v29 }
 0x482   : > { %v2627_v59 = vpop.f32.mrb[62].mxu0  ;;  %v1747_v0 = vadd.f32 %v3223_v29, %v1746_v58 }
 0x483   : > { %v1758_v62 = vadd.f32 %v2627_v59, %v3223_v29  ;;  %v1749_v63 = vpop.f32.mrb[63].mxu0 }
 0x484   : > { %v1750_v1 = vadd.f32 %v3223_v29, %v1749_v63 }
 0x485   : > { %v2242_v3 = vpack.c.bf16 %v1758_v62, %v1755_v61 }
 0x486   : > { %v2237_v4 = vpack.c.bf16 %v1750_v1, %v1747_v0 }
 0x487   : > { %2290 = vst [vmem:[%s3231_s24 + $0x38] sm:$0xff] %v2242_v3  }
 0x488   : > { %2289 = vst [vmem:[%s3231_s24 + $0x30] sm:$0xff] %v2237_v4   ;;  %v2630_v5 = vpop.f32.mrb[64].mxu0 }
 0x489   : > { %v1762_v6 = vpop.f32.mrb[65].mxu0  ;;  %v1771_v8 = vadd.f32 %v2630_v5, %v3223_v29 }
 0x48a   : > { %v2631_v7 = vpop.f32.mrb[66].mxu0  ;;  %v1763_v11 = vadd.f32 %v3223_v29, %v1762_v6 }
 0x48b   : > { %v1774_v9 = vadd.f32 %v2631_v7, %v3223_v29  ;;  %v1765_v10 = vpop.f32.mrb[67].mxu0 }
 0x48c   : > { %v1766_v12 = vadd.f32 %v3223_v29, %v1765_v10 }
 0x48d   : > { %v2252_v13 = vpack.c.bf16 %v1774_v9, %v1771_v8 }
 0x48e   : > { %v2247_v14 = vpack.c.bf16 %v1766_v12, %v1763_v11 }
 0x48f   : > { %2292 = vst [vmem:[%s3231_s24 + $0x48] sm:$0xff] %v2252_v13  }
 0x490   : > { %2291 = vst [vmem:[%s3231_s24 + $0x40] sm:$0xff] %v2247_v14   ;;  %v2634_v15 = vpop.f32.mrb[68].mxu0 }
 0x491   : > { %v1778_v16 = vpop.f32.mrb[69].mxu0  ;;  %v1787_v18 = vadd.f32 %v2634_v15, %v3223_v29 }
 0x492   : > { %v2635_v17 = vpop.f32.mrb[70].mxu0  ;;  %v1779_v21 = vadd.f32 %v3223_v29, %v1778_v16 }
 0x493   : > { %v1790_v19 = vadd.f32 %v2635_v17, %v3223_v29  ;;  %v1781_v20 = vpop.f32.mrb[71].mxu0 }
 0x494   : > { %v1782_v22 = vadd.f32 %v3223_v29, %v1781_v20 }
 0x495   : > { %v2262_v23 = vpack.c.bf16 %v1790_v19, %v1787_v18 }
 0x496   : > { %v2257_v24 = vpack.c.bf16 %v1782_v22, %v1779_v21 }
 0x497   : > { %2294 = vst [vmem:[%s3231_s24 + $0x58] sm:$0xff] %v2262_v23  }
 0x498   : > { %2293 = vst [vmem:[%s3231_s24 + $0x50] sm:$0xff] %v2257_v24   ;;  %v2638_v25 = vpop.f32.mrb[72].mxu0 }
 0x499   : > { %v1794_v26 = vpop.f32.mrb[73].mxu0  ;;  %v1803_v28 = vadd.f32 %v2638_v25, %v3223_v29 }
 0x49a   : > { %v2639_v27 = vpop.f32.mrb[74].mxu0  ;;  %v1795_v44 = vadd.f32 %v3223_v29, %v1794_v26 }
 0x49b   : > { %v1806_v30 = vadd.f32 %v2639_v27, %v3223_v29  ;;  %v1797_v31 = vpop.f32.mrb[75].mxu0 }
 0x49c   : > { %v1798_v32 = vadd.f32 %v3223_v29, %v1797_v31 }
 0x49d   : > { %v2272_v33 = vpack.c.bf16 %v1806_v30, %v1803_v28 }
 0x49e   : > { %v2267_v34 = vpack.c.bf16 %v1798_v32, %v1795_v44 }
 0x49f   : > { %2296 = vst [vmem:[%s3231_s24 + $0x68] sm:$0xff] %v2272_v33  }
 0x4a0   : > { %2295 = vst [vmem:[%s3231_s24 + $0x60] sm:$0xff] %v2267_v34   ;;  %v2642_v35 = vpop.f32.mrb[76].mxu0 }
 0x4a1   : > { %v1810_v37 = vpop.f32.mrb[77].mxu0  ;;  %v1819_v40 = vadd.f32 %v2642_v35, %v3223_v29 }
 0x4a2   : > { %v2643_v39 = vpop.f32.mrb[78].mxu0  ;;  %v1811_v43 = vadd.f32 %v3223_v29, %v1810_v37  ;;  %1992 = sbr.rel (!%p2892_p5) target bundleno = 1221 (0x4c5), region = 68 }
 0x4a3   : > { %v1822_v41 = vadd.f32 %v2643_v39, %v3223_v29  ;;  %v1813_v42 = vpop.f32.mrb[79].mxu0 }
 0x4a4   : > { %v1814_v36 = vadd.f32 %v3223_v29, %v1813_v42 }
 0x4a5   : > { %v2282_v45 = vpack.c.bf16 %v1822_v41, %v1819_v40 }
 0x4a6   : > { %v2277_v46 = vpack.c.bf16 %v1814_v36, %v1811_v43 }
 0x4a7   : > { %2298 = vst [vmem:[%s3231_s24 + $0x78] sm:$0xff] %v2282_v45  }
 0x4a8   : > { %2297 = vst [vmem:[%s3231_s24 + $0x70] sm:$0xff] %v2277_v46  }
 0x4a9   : > { %s3359_s25 = smov (!%p1995_p11, %s1994_s25), 32 }
 0x4aa   : > { %s3284_s29 = sshll.u32 %s3359_s25, 6 }
 0x4ab   : > { %s1999_s12 = ssub.s32 2048, %s3284_s29 }
 0x4ac   : > { %2000 = vsyncadd %s3279_s30, %s1999_s12  ;;  %p2165_p12 = scmp.ne.s32.totalorder %s3284_s29, 0  ;;  %s2203_s13 = sshll.u32 %s2875_s21, 11 }
 0x4ad   : > { %s3293_s16 = scalar_lea.hbm %s3351_s11, %s2203_s13  ;;  %s2005_s14 = sshll.u32 %s3231_s24, 4  ;;  %s3296_s14 = int_to_ptr.vmem [resolvable:$true] %s2005_s14 }
 0x4ae   : > { %s2727_s22 = scalar_lea.vmem %s3296_s14, %s3284_s29  ;;  %s2791_s25 = smov [#allocation2]  }
 0x4af   : > { %p2728_p13 = scmp.ne.s32.totalorder %s3296_s14, %s2727_s22  ;;  %s2731_s12 = sshll.u32 %s2791_s25, 4  ;;  %s2732_s12 = int_to_ptr.vmem [resolvable:$false] %s2731_s12 }
 0x4b0   : > { %s2733_s21 = scalar_lea.vmem %s2732_s12, 4096  ;;  %p2734_p2 = scmp.lt.s32.totalorder %s3296_s14, %s2732_s12 }
 0x4b1   : > { %p2729_p0 = pnand %p2728_p13, %p2165_p12  ;;  %p2735_p3 = scmp.lt.s32.totalorder %s2733_s21, %s2727_s22 }
 0x4b3   : > { %p2730_p1 = pneg %p2729_p0  ;;  %p2736_p4 = por %p2735_p3, %p2734_p2 }
 0x4b5   : > { %p2737_p5 = pnand %p2736_p4, %p2730_p1 }
 0x4b7   : > { %2740 = shalt.err (!%p2737_p5)
}
 0x4b8   : > { %s2741_s24 = scalar_lea.hbm %s3293_s16, %s3284_s29  ;;  %s2745_s27 = scalar_lea.hbm %s3351_s11, 4032 }
 0x4b9   : > { %p2742_p7 = scmp.ne.s32.totalorder %s3293_s16, %s2741_s24  ;;  %p2746_p10 = scmp.lt.u32.totalorder %s3293_s16, %s3351_s11 }
 0x4ba   : > { %p2747_p11 = scmp.lt.u32.totalorder %s2745_s27, %s2741_s24  ;;  %p2749_p0 = scmp.lt.u32.totalorder %s2741_s24, %s3293_s16 }
 0x4bb   : > { %p2743_p8 = pnand %p2742_p7, %p2165_p12 }
 0x4bc   : > { %p2748_p13 = por %p2747_p11, %p2746_p10 }
 0x4bd   : > { %p2744_p9 = pneg %p2743_p8 }
 0x4be   : > { %p2750_p1 = por %p2749_p0, %p2748_p13 }
 0x4c0   : > { %p2751_p2 = pnand %p2750_p1, %p2744_p9 }
 0x4c2   : > { %2754 = shalt.err (!%p2751_p2)
}
 0x4c3   : > { %s2792_s12 = smov 64   ;;  %s2793_s21 = smov 4  }
 0x4c4   : > { %2011 = dma.vmem_to_hbm [thread:$0]  (%p2165_p12), %s3296_s14, %s3284_s29, %s3293_s16, %s3279_s30, %s2792_s12, %s2792_s12, %s2793_s21  }
 0x4c5 PF: > { %p2657_p3 = scmp.ge.s32.totalorder %s2789_s20, 2  ;;  %s2020_s13 = sand.u32 1, %s2777_s17  }
 0x4c6   : > { %s2021_s24 = scalar_lea.sflag [#allocation3], %s2020_s13 }
 0x4c7   : > { %p2654_p4 = pnand %p2657_p3, %p2896_p6 }
 0x4c9   : > { %2772 = dma.done.wait (!%p2654_p4), %s2021_s24, 2048  }
 0x4ca   : > { %2774 = vsyncadd (!%p2654_p4), %s2021_s24, 4294965248  ;;  %p21_p5 = scmp.ge.s32.totalorder %s2879_s23, 4   ;;  %s3354_s17 = smov %s2781_s18 }
 0x4cb   : > { %s3355_s18 = smov %s2785_s19  ;;  %s3356_s19 = smov %s2890_s26 }
 0x4cc   : > { %s3357_s20 = smov %s2879_s23  ;;  %23 = sbr.rel (!%p21_p5) target bundleno = 3 (0x3), region = 99 }
 0x4d3   :  { %2026 = vsyncpa [#allocation3], 1 }
 0x4d4   :  { %2028 = vsyncpa [#allocation3 + $0x1], 1 }

</bundles_post_ra>
